<compile_context>
chip_gen: v7x
topology: tpu7x:2x2x1
jax: 0.10.0
libtpu: 0.0.40
codegen_flags: <defaults>
</compile_context>

<pallas_src>
import functools

import jax
import jax.numpy as jnp
from jax import lax
from jax.experimental import pallas as pl
from jax.experimental.pallas import tpu as pltpu

BN_EPS = 1e-5
NEG_PAD = -1e30  # logit value for padded classes; exp(NEG_PAD - m) == 0 in f32


def _sigmoid(v):
    # One EUP transcendental per gate (instead of exp + divide).
    return 0.5 * jnp.tanh(0.5 * v) + 0.5


# ----------------------------------------------------------------------------
# Fused kernel: streamed LSTM1 recurrence + head (lstm2 cell, fc1+relu, fc2,
# log_softmax).  Grid = (batch tiles [parallel], time chunks [arbitrary]);
# h/c live in VMEM scratch across time chunks.
# ----------------------------------------------------------------------------
def _fused_kernel(
    x_ref,                 # (Tc, BT, D)  time-major chunk of the input (f32)
    wih1_ref,              # (D, 4*H1)    lstm1 input->gates (bf16, pre-transposed)
    whh1_ref,              # (H1, 4*H1)   lstm1 hidden->gates (bf16, pre-transposed)
    b1_ref,                # (1, 4*H1)    lstm1 combined bias (f32)
    w2_ref,                # (H1, 3*H2)   lstm2 fused [i,g,o] weights, BN1 folded (bf16)
    b2_ref,                # (1, 3*H2)    lstm2 fused biases (f32)
    wf1_ref, bf1_ref,      # (H2, F1) bf16, (1, F1) f32   fc1 with BN2 folded in
    wf2_ref, bf2_ref,      # (F1, Cp) bf16, (1, Cp) f32   fc2 padded to lane-dense Cp
    out_ref,               # (BT, Cp) f32
    xp_sc,                 # VMEM (Tc*BT, 4*H1) f32   hoisted input projection
    h_sc,                  # VMEM (BT, H1) f32
    c_sc,                  # VMEM (BT, H1) f32
    *, seq_len,            # real (unpadded) sequence length, static
):
    Tc, BT, D = x_ref.shape
    H1 = whh1_ref.shape[0]
    H2 = wf1_ref.shape[0]

    t_idx = pl.program_id(1)

    @pl.when(t_idx == 0)
    def _init():
        h_sc[...] = jnp.zeros_like(h_sc)
        c_sc[...] = jnp.zeros_like(c_sc)

    # Hoisted input projection for this chunk: one big bf16 MXU matmul, f32 acc.
    # The (Tc, BT, D) -> (Tc*BT, D) reshape is a pure sublane-tile relabel (BT % 8 == 0).
    x2 = x_ref[...].reshape(Tc * BT, D).astype(jnp.bfloat16)
    xp_sc[...] = (
        jnp.dot(x2, wih1_ref[...], preferred_element_type=jnp.float32) + b1_ref[...]
    )

    def step(t, carry):
        h, c = carry
        # Recurrent dot: bf16 operands, f32 accumulate; weight streamed from VMEM
        # (not hoisted as a value -> no 64-vreg live range across the unroll).
        rec = jnp.dot(h.astype(jnp.bfloat16), whh1_ref[...],
                      preferred_element_type=jnp.float32)
        off = pl.multiple_of(t * BT, BT)
        gates = xp_sc[pl.ds(off, BT), :] + rec      # (BT, 4*H1), gate order [i,f,g,o]
        i_g = _sigmoid(gates[:, 0:H1])
        f_g = _sigmoid(gates[:, H1:2 * H1])
        g_g = jnp.tanh(gates[:, 2 * H1:3 * H1])
        o_g = _sigmoid(gates[:, 3 * H1:4 * H1])
        c_new = f_g * c + i_g * g_g
        h_new = o_g * jnp.tanh(c_new)
        # Mask padded tail timesteps (zero-padded x is NOT a no-op: gates = bias).
        valid = (t_idx * Tc + t) < seq_len
        h_new = jnp.where(valid, h_new, h)
        c_new = jnp.where(valid, c_new, c)
        return (h_new, c_new)

    h, c = lax.fori_loop(0, Tc, step, (h_sc[...], c_sc[...]), unroll=8)
    h_sc[...] = h
    c_sc[...] = c

    @pl.when(t_idx == pl.num_programs(1) - 1)
    def _head():
        # LSTM2 single zero-state step (BN1 folded in); forget gate dead (c0 == 0).
        # The three gate matmuls are fused into one (H1, 3*H2) dot.
        h16 = h.astype(jnp.bfloat16)
        g3 = jnp.dot(h16, w2_ref[...], preferred_element_type=jnp.float32) + b2_ref[...]
        i_g = _sigmoid(g3[:, 0:H2])
        g_g = jnp.tanh(g3[:, H2:2 * H2])
        o_g = _sigmoid(g3[:, 2 * H2:3 * H2])
        h2 = o_g * jnp.tanh(i_g * g_g)              # (BT, H2)

        # fc1 (BN2 folded) + ReLU.  Dropout(0.4) is identity in eval mode.
        y = jnp.dot(h2.astype(jnp.bfloat16), wf1_ref[...],
                    preferred_element_type=jnp.float32) + bf1_ref[...]
        y = jnp.maximum(y, 0.0)

        # fc2 (classes padded to 128 lanes; pad logits are -1e30 -> no softmax effect).
        z = jnp.dot(y.astype(jnp.bfloat16), wf2_ref[...],
                    preferred_element_type=jnp.float32) + bf2_ref[...]

        # log_softmax over classes (f32).
        m = jnp.max(z, axis=-1, keepdims=True)
        lse = m + jnp.log(jnp.sum(jnp.exp(z - m), axis=-1, keepdims=True))
        out_ref[...] = z - lse


# ----------------------------------------------------------------------------
# Wrapper
# ----------------------------------------------------------------------------
def _round_up(n, m):
    return ((n + m - 1) // m) * m


def _pick_time_chunk(T, bt, d, h1, *, max_chunk=128, budget_bytes=6 * 1024 * 1024):
    """Tc: multiple of 8, bounded so the f32 xp scratch + double-buffered x blocks
    fit a small VMEM budget (safe on v7x's 64 MiB / 32 MiB-scoped VMEM)."""
    per_t = bt * (4 * h1 * 4 + 2 * d * 4)
    tc = max(8, min(max_chunk, (budget_bytes // per_t) // 8 * 8))
    tc = min(tc, _round_up(T, 8))
    return tc


def _vmem_limit_bytes(bt, tc, d, h1, h2, f1, c_pad):
    f32, bf16 = 4, 2
    scratch = tc * bt * 4 * h1 * f32 + 2 * bt * h1 * f32
    x_blocks = 2 * tc * bt * d * f32
    out_blocks = 2 * bt * c_pad * f32
    weights = 2 * (d * 4 * h1 * bf16 + h1 * 4 * h1 * bf16 + 4 * h1 * f32
                   + h1 * 3 * h2 * bf16 + 3 * h2 * f32
                   + h2 * f1 * bf16 + f1 * f32
                   + f1 * c_pad * bf16 + c_pad * f32)
    total = scratch + x_blocks + out_blocks + weights
    # generous headroom, but stay under v7x's 64 MiB physical VMEM
    return int(min(max(2 * total, 16 * 1024 * 1024), 60 * 1024 * 1024))


def _const_spec(shape):
    return pl.BlockSpec(shape, lambda b, t: (0, 0))


@functools.partial(jax.jit, static_argnames=("num_classes",))
def lstm_model_forward(x, kp, *, num_classes):
    """x: (B, T, D) float32.  kp: pre-folded kernel params.  Returns (B, num_classes)."""
    B, T, D = x.shape
    H1 = kp["whh1_t"].shape[0]
    H2 = kp["wf1_t"].shape[0]
    F1 = kp["wf1_t"].shape[1]
    C_pad = kp["wf2_t"].shape[1]

    # Batch tiling: BT is a multiple of 8 (one or more sublane groups); a leading
    # "parallel" grid axis over batch tiles lets v7x's two TensorCores split work.
    BT = min(_round_up(B, 8), 128)
    B_pad = _round_up(B, BT)
    n_btiles = B_pad // BT

    Tc = _pick_time_chunk(T, BT, D, H1)
    n_tchunks = -(-T // Tc)
    T_pad = n_tchunks * Tc

    if B_pad != B or T_pad != T:
        x = jnp.pad(x, ((0, B_pad - B), (0, T_pad - T), (0, 0)))
    # time-major; kept 3-D so the kernel block is a plain (Tc, BT, D) slab
    x_tm = jnp.transpose(x, (1, 0, 2))                     # (T_pad, B_pad, D)

    kernel = functools.partial(_fused_kernel, seq_len=T)

    args = (
        x_tm,
        kp["wih1_t"], kp["whh1_t"], kp["b1"],
        kp["w2_t"], kp["b2"],
        kp["wf1_t"], kp["bf1"],
        kp["wf2_t"], kp["bf2"],
    )
    in_specs = [pl.BlockSpec((Tc, BT, D), lambda b, t: (t, b, 0))]
    in_specs += [_const_spec(a.shape) for a in args[1:]]

    out_padded = pl.pallas_call(
        kernel,
        out_shape=jax.ShapeDtypeStruct((B_pad, C_pad), jnp.float32),
        grid_spec=pltpu.PrefetchScalarGridSpec(
            num_scalar_prefetch=0,
            grid=(n_btiles, n_tchunks),
            in_specs=in_specs,
            out_specs=pl.BlockSpec((BT, C_pad), lambda b, t: (b, 0)),
            scratch_shapes=[
                pltpu.VMEM((Tc * BT, 4 * H1), jnp.float32),  # hoisted x-projection
                pltpu.VMEM((BT, H1), jnp.float32),           # h carry
                pltpu.VMEM((BT, H1), jnp.float32),           # c carry
            ],
        ),
        compiler_params=pltpu.CompilerParams(
            dimension_semantics=("parallel", "arbitrary"),
            vmem_limit_bytes=_vmem_limit_bytes(BT, Tc, D, H1, H2, F1, C_pad),
        ),
    )(*args)

    return out_padded[:B, :num_classes]


# ----------------------------------------------------------------------------
# Parameters: PyTorch-style init + one-time folding into kernel-ready layout.
# ----------------------------------------------------------------------------
def init_params(key, input_size, num_classes, h1=128, h2=64, fc_hidden=32):
    keys = jax.random.split(key, 16)

    def u(k, shape, fan):
        bound = 1.0 / jnp.sqrt(fan)
        return jax.random.uniform(k, shape, jnp.float32, -bound, bound)

    p = {}
    p["lstm1_w_ih"] = u(keys[0], (4 * h1, input_size), h1)
    p["lstm1_w_hh"] = u(keys[1], (4 * h1, h1), h1)
    p["lstm1_b_ih"] = u(keys[2], (4 * h1,), h1)
    p["lstm1_b_hh"] = u(keys[3], (4 * h1,), h1)
    p["bn1_gamma"] = jnp.ones((h1,), jnp.float32)
    p["bn1_beta"] = jnp.zeros((h1,), jnp.float32)
    p["bn1_mean"] = jnp.zeros((h1,), jnp.float32)
    p["bn1_var"] = jnp.ones((h1,), jnp.float32)
    p["lstm2_w_ih"] = u(keys[4], (4 * h2, h1), h2)
    p["lstm2_w_hh"] = u(keys[5], (4 * h2, h2), h2)  # unused (h0 = 0), kept for fidelity
    p["lstm2_b_ih"] = u(keys[6], (4 * h2,), h2)
    p["lstm2_b_hh"] = u(keys[7], (4 * h2,), h2)
    p["bn2_gamma"] = jnp.ones((h2,), jnp.float32)
    p["bn2_beta"] = jnp.zeros((h2,), jnp.float32)
    p["bn2_mean"] = jnp.zeros((h2,), jnp.float32)
    p["bn2_var"] = jnp.ones((h2,), jnp.float32)
    p["fc1_w"] = u(keys[8], (fc_hidden, h2), h2)
    p["fc1_b"] = u(keys[9], (fc_hidden,), h2)
    p["fc2_w"] = u(keys[10], (num_classes, fc_hidden), fc_hidden)
    p["fc2_b"] = u(keys[11], (num_classes,), fc_hidden)
    return p


def fold_params(p, eps=BN_EPS):
    """One-time host-side folding: transposes, bias merges, BN folds, gate fusion,
    class padding, bf16 casts of all matmul weights (biases stay f32)."""
    h1 = p["lstm1_w_hh"].shape[1]
    h2 = p["fc1_w"].shape[1]
    kp = {}

    # lstm1
    kp["wih1_t"] = jnp.asarray(p["lstm1_w_ih"].T, jnp.bfloat16)          # (D, 4H1)
    kp["whh1_t"] = jnp.asarray(p["lstm1_w_hh"].T, jnp.bfloat16)          # (H1, 4H1)
    kp["b1"] = (p["lstm1_b_ih"] + p["lstm1_b_hh"]).reshape(1, -1).astype(jnp.float32)

    # BN1 (eval) folded into lstm2 input projection; fuse [i, g, o] gates, drop f.
    s1 = p["bn1_gamma"] * lax.rsqrt(p["bn1_var"] + eps)                  # (H1,)
    t1 = p["bn1_beta"] - p["bn1_mean"] * s1                              # (H1,)
    wih2_t = p["lstm2_w_ih"].T.astype(jnp.float32)                       # (H1, 4H2)
    b2 = (p["lstm2_b_ih"] + p["lstm2_b_hh"]).astype(jnp.float32)         # (4H2,)
    wih2_t_f = wih2_t * s1[:, None]
    b2_f = b2 + t1 @ wih2_t
    kp["w2_t"] = jnp.concatenate(
        [wih2_t_f[:, 0:h2], wih2_t_f[:, 2 * h2:3 * h2], wih2_t_f[:, 3 * h2:4 * h2]],
        axis=1).astype(jnp.bfloat16)                                     # (H1, 3H2)
    kp["b2"] = jnp.concatenate(
        [b2_f[0:h2], b2_f[2 * h2:3 * h2], b2_f[3 * h2:4 * h2]]
    ).reshape(1, -1).astype(jnp.float32)

    # BN2 (eval) folded into fc1
    s2 = p["bn2_gamma"] * lax.rsqrt(p["bn2_var"] + eps)
    t2 = p["bn2_beta"] - p["bn2_mean"] * s2
    w1_t = p["fc1_w"].T.astype(jnp.float32)                              # (H2, F1)
    kp["wf1_t"] = (w1_t * s2[:, None]).astype(jnp.bfloat16)
    kp["bf1"] = (p["fc1_b"] + t2 @ w1_t).reshape(1, -1).astype(jnp.float32)

    # fc2 padded to a lane-dense class dimension (pad logits forced to -1e30)
    c = p["fc2_w"].shape[0]
    c_pad = max(128, _round_up(c, 128))
    w2fc_t = p["fc2_w"].T.astype(jnp.float32)                            # (F1, C)
    kp["wf2_t"] = jnp.pad(w2fc_t, ((0, 0), (0, c_pad - c))).astype(jnp.bfloat16)
    kp["bf2"] = jnp.concatenate(
        [p["fc2_b"], jnp.full((c_pad - c,), NEG_PAD, jnp.float32)]
    ).reshape(1, -1)
    return kp


# ----------------------------------------------------------------------------
# Pure-JAX reference (eval-mode BN, identity dropout) for correctness check.
# ----------------------------------------------------------------------------
def _reference_forward(x, p, eps=BN_EPS):
    B = x.shape[0]
    hp = lax.Precision.HIGHEST

    def lstm(xs, w_ih, w_hh, b_ih, b_hh, H):
        h = jnp.zeros((B, H), jnp.float32)
        c = jnp.zeros((B, H), jnp.float32)
        for t in range(xs.shape[1]):
            g = (jnp.dot(xs[:, t, :], w_ih.T, precision=hp)
                 + jnp.dot(h, w_hh.T, precision=hp) + b_ih + b_hh)
            i = jax.nn.sigmoid(g[:, 0:H])
            f = jax.nn.sigmoid(g[:, H:2 * H])
            gg = jnp.tanh(g[:, 2 * H:3 * H])
            o = jax.nn.sigmoid(g[:, 3 * H:4 * H])
            c = f * c + i * gg
            h = o * jnp.tanh(c)
        return h

    def bn(v, g, b, m, var):
        return (v - m) * lax.rsqrt(var + eps) * g + b

    h1 = lstm(x, p["lstm1_w_ih"], p["lstm1_w_hh"], p["lstm1_b_ih"], p["lstm1_b_hh"], 128)
    h1 = bn(h1, p["bn1_gamma"], p["bn1_beta"], p["bn1_mean"], p["bn1_var"])
    h2 = lstm(h1[:, None, :], p["lstm2_w_ih"], p["lstm2_w_hh"],
              p["lstm2_b_ih"], p["lstm2_b_hh"], 64)
    h2 = bn(h2, p["bn2_gamma"], p["bn2_beta"], p["bn2_mean"], p["bn2_var"])
    y = jnp.maximum(jnp.dot(h2, p["fc1_w"].T, precision=hp) + p["fc1_b"], 0.0)
    z = jnp.dot(y, p["fc2_w"].T, precision=hp) + p["fc2_b"]
    return jax.nn.log_softmax(z, axis=-1)


if __name__ == "__main__":
    NUM_CLASSES = 10
    key = jax.random.PRNGKey(0)
    k_x, k_p, k_x2 = jax.random.split(key, 3)

    # main config
    B, T, D = 2, 8, 16
    x = jax.random.normal(k_x, (B, T, D), jnp.float32)

    params = init_params(k_p, input_size=D, num_classes=NUM_CLASSES)
    kparams = fold_params(params)  # one-time: transposes / bias merges / BN folds / bf16

    out = lstm_model_forward(x, kparams, num_classes=NUM_CLASSES)
    out = jax.block_until_ready(out)

    assert out.shape == (B, NUM_CLASSES), out.shape
    row_sums = jnp.exp(out).sum(axis=1)
    assert bool(jnp.all(jnp.abs(row_sums - 1.0) < 1e-4)), row_sums

    ref = _reference_forward(x, params)
    max_diff = float(jnp.max(jnp.abs(out - ref)))
    # bf16 MXU operands (f32 accumulate) -> slightly looser tolerance than pure-f32.
    assert max_diff < 2e-2, f"mismatch vs reference: {max_diff}"

    # second config exercises the masked time-remainder path (prime T, odd batch)
    B2, T2 = 3, 11
    x2 = jax.random.normal(k_x2, (B2, T2, D), jnp.float32)
    out2 = jax.block_until_ready(lstm_model_forward(x2, kparams, num_classes=NUM_CLASSES))
    assert out2.shape == (B2, NUM_CLASSES), out2.shape
    ref2 = _reference_forward(x2, params)
    max_diff2 = float(jnp.max(jnp.abs(out2 - ref2)))
    assert max_diff2 < 2e-2, f"mismatch vs reference (masked tail): {max_diff2}"

    print("KERNEL_OK")
</pallas_src>

<mosaic_0001>
module attributes {stable_mosaic.version = 11 : i64} {
  func.func @_fused_kernel(%arg0: i32, %arg1: i32, %arg2: memref<8x8x16xf32, #tpu.memory_space<vmem>>, %arg3: memref<16x512xbf16, #tpu.memory_space<vmem>>, %arg4: memref<128x512xbf16, #tpu.memory_space<vmem>>, %arg5: memref<1x512xf32, #tpu.memory_space<vmem>>, %arg6: memref<128x192xbf16, #tpu.memory_space<vmem>>, %arg7: memref<1x192xf32, #tpu.memory_space<vmem>>, %arg8: memref<64x32xbf16, #tpu.memory_space<vmem>>, %arg9: memref<1x32xf32, #tpu.memory_space<vmem>>, %arg10: memref<32x128xbf16, #tpu.memory_space<vmem>>, %arg11: memref<1x128xf32, #tpu.memory_space<vmem>>, %arg12: memref<8x128xf32, #tpu.memory_space<vmem>>, %arg13: memref<64x512xf32, #tpu.memory_space<vmem>>, %arg14: memref<8x128xf32, #tpu.memory_space<vmem>>, %arg15: memref<8x128xf32, #tpu.memory_space<vmem>>) attributes {dimension_semantics = [#tpu.dimension_semantics<parallel>, #tpu.dimension_semantics<arbitrary>], iteration_bounds = array<i64: 1, 1>, scalar_prefetch = 0 : i64, scratch_operands = 3 : i64, tpu.core_type = #tpu.core_type<tc>, window_params = [{transform_indices = @transform_0, window_bounds = array<i64: 8, 8, 16>}, {pipeline_mode = #tpu.pipeline_mode<synchronous>, transform_indices = @transform_1, window_bounds = array<i64: 16, 512>}, {pipeline_mode = #tpu.pipeline_mode<synchronous>, transform_indices = @transform_2, window_bounds = array<i64: 128, 512>}, {pipeline_mode = #tpu.pipeline_mode<synchronous>, transform_indices = @transform_3, window_bounds = array<i64: 1, 512>}, {pipeline_mode = #tpu.pipeline_mode<synchronous>, transform_indices = @transform_4, window_bounds = array<i64: 128, 192>}, {pipeline_mode = #tpu.pipeline_mode<synchronous>, transform_indices = @transform_5, window_bounds = array<i64: 1, 192>}, {pipeline_mode = #tpu.pipeline_mode<synchronous>, transform_indices = @transform_6, window_bounds = array<i64: 64, 32>}, {pipeline_mode = #tpu.pipeline_mode<synchronous>, transform_indices = @transform_7, window_bounds = array<i64: 1, 32>}, {pipeline_mode = #tpu.pipeline_mode<synchronous>, transform_indices = @transform_8, window_bounds = array<i64: 32, 128>}, {pipeline_mode = #tpu.pipeline_mode<synchronous>, transform_indices = @transform_9, window_bounds = array<i64: 1, 128>}, {transform_indices = @transform_10, window_bounds = array<i64: 8, 128>}]} {
    %c0_i32 = arith.constant 0 : i32
    %0 = arith.cmpi eq, %arg1, %c0_i32 : i32
    %1 = arith.extui %0 : i1 to i32
    %c0_i32_0 = arith.constant 0 : i32
    %2 = arith.cmpi ne, %1, %c0_i32_0 : i32
    scf.if %2 {
      %cst_148 = arith.constant 0.000000e+00 : f32
      %371 = vector.broadcast %cst_148 : f32 to vector<8x128xf32>
      %c0_149 = arith.constant 0 : index
      %c0_150 = arith.constant 0 : index
      %372 = vector.load %arg14[%c0_149, %c0_150] : memref<8x128xf32, #tpu.memory_space<vmem>>, vector<8x128xf32>
      tpu.vector_store %arg14[%c0_149, %c0_150], %371 {strides = array<i32>} : memref<8x128xf32, #tpu.memory_space<vmem>>, vector<8x128xf32>,
      %cst_151 = arith.constant 0.000000e+00 : f32
      %373 = vector.broadcast %cst_151 : f32 to vector<8x128xf32>
      %c0_152 = arith.constant 0 : index
      %c0_153 = arith.constant 0 : index
      %374 = vector.load %arg15[%c0_152, %c0_153] : memref<8x128xf32, #tpu.memory_space<vmem>>, vector<8x128xf32>
      tpu.vector_store %arg15[%c0_152, %c0_153], %373 {strides = array<i32>} : memref<8x128xf32, #tpu.memory_space<vmem>>, vector<8x128xf32>,
    } else {
    }
    %c0 = arith.constant 0 : index
    %c0_1 = arith.constant 0 : index
    %c0_2 = arith.constant 0 : index
    %3 = vector.load %arg2[%c0, %c0_1, %c0_2] : memref<8x8x16xf32, #tpu.memory_space<vmem>>, vector<8x8x16xf32>
    %4 = vector.shape_cast %3 : vector<8x8x16xf32> to vector<64x16xf32>
    %5 = arith.truncf %4 : vector<64x16xf32> to vector<64x16xbf16>
    %c0_3 = arith.constant 0 : index
    %c0_4 = arith.constant 0 : index
    %6 = vector.load %arg3[%c0_3, %c0_4] : memref<16x512xbf16, #tpu.memory_space<vmem>>, vector<16x512xbf16>
    %cst = arith.constant dense<0.000000e+00> : vector<64x512xf32>
    %7 = tpu.matmul %5, %6, %cst {dimension_numbers = #tpu.dot_dimension_numbers<[1], [0], [0], [1], [0, 0, 1, 1], [], []>} : vector<64x16xbf16>, vector<16x512xbf16>, vector<64x512xf32> -> vector<64x512xf32>
    %c0_5 = arith.constant 0 : index
    %c0_6 = arith.constant 0 : index
    %8 = vector.load %arg5[%c0_5, %c0_6] : memref<1x512xf32, #tpu.memory_space<vmem>>, vector<1x512xf32>
    %9 = vector.broadcast %8 : vector<1x512xf32> to vector<64x512xf32>
    %10 = arith.addf %7, %9 : vector<64x512xf32>
    %c0_7 = arith.constant 0 : index
    %c0_8 = arith.constant 0 : index
    %11 = vector.load %arg13[%c0_7, %c0_8] : memref<64x512xf32, #tpu.memory_space<vmem>>, vector<64x512xf32>
    tpu.vector_store %arg13[%c0_7, %c0_8], %10 {strides = array<i32>} : memref<64x512xf32, #tpu.memory_space<vmem>>, vector<64x512xf32>,
    %c0_9 = arith.constant 0 : index
    %c0_10 = arith.constant 0 : index
    %12 = vector.load %arg14[%c0_9, %c0_10] : memref<8x128xf32, #tpu.memory_space<vmem>>, vector<8x128xf32>
    %c0_11 = arith.constant 0 : index
    %c0_12 = arith.constant 0 : index
    %13 = vector.load %arg15[%c0_11, %c0_12] : memref<8x128xf32, #tpu.memory_space<vmem>>, vector<8x128xf32>
    %c0_i32_13 = arith.constant 0 : i32
    %14 = arith.truncf %12 : vector<8x128xf32> to vector<8x128xbf16>
    %c0_14 = arith.constant 0 : index
    %c0_15 = arith.constant 0 : index
    %15 = vector.load %arg4[%c0_14, %c0_15] : memref<128x512xbf16, #tpu.memory_space<vmem>>, vector<128x512xbf16>
    %cst_16 = arith.constant dense<0.000000e+00> : vector<8x512xf32>
    %16 = tpu.matmul %14, %15, %cst_16 {dimension_numbers = #tpu.dot_dimension_numbers<[1], [0], [0], [1], [0, 0, 1, 1], [], []>} : vector<8x128xbf16>, vector<128x512xbf16>, vector<8x512xf32> -> vector<8x512xf32>
    %c8_i32 = arith.constant 8 : i32
    %17 = arith.muli %c0_i32_13, %c8_i32 : i32
    %18 = tpu.assume_multiple %17, 8 : i32
    %19 = arith.index_cast %18 : i32 to index
    %c0_17 = arith.constant 0 : index
    %20 = vector.load %arg13[%19, %c0_17] : memref<64x512xf32, #tpu.memory_space<vmem>>, vector<8x512xf32>
    %21 = arith.addf %20, %16 : vector<8x512xf32>
    %22 = vector.extract_strided_slice %21 {offsets = [0, 0], sizes = [8, 128], strides = [1, 1]} : vector<8x512xf32> to vector<8x128xf32>
    %cst_18 = arith.constant 5.000000e-01 : f32
    %23 = vector.broadcast %cst_18 : f32 to vector<8x128xf32>
    %24 = arith.mulf %23, %22 : vector<8x128xf32>
    %25 = math.tanh %24 : vector<8x128xf32>
    %cst_19 = arith.constant 5.000000e-01 : f32
    %26 = vector.broadcast %cst_19 : f32 to vector<8x128xf32>
    %27 = arith.mulf %26, %25 : vector<8x128xf32>
    %cst_20 = arith.constant 5.000000e-01 : f32
    %28 = vector.broadcast %cst_20 : f32 to vector<8x128xf32>
    %29 = arith.addf %27, %28 : vector<8x128xf32>
    %30 = vector.extract_strided_slice %21 {offsets = [0, 128], sizes = [8, 128], strides = [1, 1]} : vector<8x512xf32> to vector<8x128xf32>
    %cst_21 = arith.constant 5.000000e-01 : f32
    %31 = vector.broadcast %cst_21 : f32 to vector<8x128xf32>
    %32 = arith.mulf %31, %30 : vector<8x128xf32>
    %33 = math.tanh %32 : vector<8x128xf32>
    %cst_22 = arith.constant 5.000000e-01 : f32
    %34 = vector.broadcast %cst_22 : f32 to vector<8x128xf32>
    %35 = arith.mulf %34, %33 : vector<8x128xf32>
    %cst_23 = arith.constant 5.000000e-01 : f32
    %36 = vector.broadcast %cst_23 : f32 to vector<8x128xf32>
    %37 = arith.addf %35, %36 : vector<8x128xf32>
    %38 = vector.extract_strided_slice %21 {offsets = [0, 256], sizes = [8, 128], strides = [1, 1]} : vector<8x512xf32> to vector<8x128xf32>
    %39 = math.tanh %38 : vector<8x128xf32>
    %40 = vector.extract_strided_slice %21 {offsets = [0, 384], sizes = [8, 128], strides = [1, 1]} : vector<8x512xf32> to vector<8x128xf32>
    %cst_24 = arith.constant 5.000000e-01 : f32
    %41 = vector.broadcast %cst_24 : f32 to vector<8x128xf32>
    %42 = arith.mulf %41, %40 : vector<8x128xf32>
    %43 = math.tanh %42 : vector<8x128xf32>
    %cst_25 = arith.constant 5.000000e-01 : f32
    %44 = vector.broadcast %cst_25 : f32 to vector<8x128xf32>
    %45 = arith.mulf %44, %43 : vector<8x128xf32>
    %cst_26 = arith.constant 5.000000e-01 : f32
    %46 = vector.broadcast %cst_26 : f32 to vector<8x128xf32>
    %47 = arith.addf %45, %46 : vector<8x128xf32>
    %48 = arith.mulf %37, %13 : vector<8x128xf32>
    %49 = arith.mulf %29, %39 : vector<8x128xf32>
    %50 = arith.addf %48, %49 : vector<8x128xf32>
    %51 = math.tanh %50 : vector<8x128xf32>
    %52 = arith.mulf %47, %51 : vector<8x128xf32>
    %c8_i32_27 = arith.constant 8 : i32
    %53 = arith.muli %arg1, %c8_i32_27 : i32
    %54 = arith.addi %53, %c0_i32_13 : i32
    %c8_i32_28 = arith.constant 8 : i32
    %55 = arith.cmpi slt, %54, %c8_i32_28 : i32
    %56 = arith.select %55, %52, %12 : vector<8x128xf32>
    %57 = arith.select %55, %50, %13 : vector<8x128xf32>
    %c1_i32 = arith.constant 1 : i32
    %58 = arith.truncf %56 : vector<8x128xf32> to vector<8x128xbf16>
    %c0_29 = arith.constant 0 : index
    %c0_30 = arith.constant 0 : index
    %59 = vector.load %arg4[%c0_29, %c0_30] : memref<128x512xbf16, #tpu.memory_space<vmem>>, vector<128x512xbf16>
    %cst_31 = arith.constant dense<0.000000e+00> : vector<8x512xf32>
    %60 = tpu.matmul %58, %59, %cst_31 {dimension_numbers = #tpu.dot_dimension_numbers<[1], [0], [0], [1], [0, 0, 1, 1], [], []>} : vector<8x128xbf16>, vector<128x512xbf16>, vector<8x512xf32> -> vector<8x512xf32>
    %c8_i32_32 = arith.constant 8 : i32
    %61 = arith.muli %c1_i32, %c8_i32_32 : i32
    %62 = tpu.assume_multiple %61, 8 : i32
    %63 = arith.index_cast %62 : i32 to index
    %c0_33 = arith.constant 0 : index
    %64 = vector.load %arg13[%63, %c0_33] : memref<64x512xf32, #tpu.memory_space<vmem>>, vector<8x512xf32>
    %65 = arith.addf %64, %60 : vector<8x512xf32>
    %66 = vector.extract_strided_slice %65 {offsets = [0, 0], sizes = [8, 128], strides = [1, 1]} : vector<8x512xf32> to vector<8x128xf32>
    %cst_34 = arith.constant 5.000000e-01 : f32
    %67 = vector.broadcast %cst_34 : f32 to vector<8x128xf32>
    %68 = arith.mulf %67, %66 : vector<8x128xf32>
    %69 = math.tanh %68 : vector<8x128xf32>
    %cst_35 = arith.constant 5.000000e-01 : f32
    %70 = vector.broadcast %cst_35 : f32 to vector<8x128xf32>
    %71 = arith.mulf %70, %69 : vector<8x128xf32>
    %cst_36 = arith.constant 5.000000e-01 : f32
    %72 = vector.broadcast %cst_36 : f32 to vector<8x128xf32>
    %73 = arith.addf %71, %72 : vector<8x128xf32>
    %74 = vector.extract_strided_slice %65 {offsets = [0, 128], sizes = [8, 128], strides = [1, 1]} : vector<8x512xf32> to vector<8x128xf32>
    %cst_37 = arith.constant 5.000000e-01 : f32
    %75 = vector.broadcast %cst_37 : f32 to vector<8x128xf32>
    %76 = arith.mulf %75, %74 : vector<8x128xf32>
    %77 = math.tanh %76 : vector<8x128xf32>
    %cst_38 = arith.constant 5.000000e-01 : f32
    %78 = vector.broadcast %cst_38 : f32 to vector<8x128xf32>
    %79 = arith.mulf %78, %77 : vector<8x128xf32>
    %cst_39 = arith.constant 5.000000e-01 : f32
    %80 = vector.broadcast %cst_39 : f32 to vector<8x128xf32>
    %81 = arith.addf %79, %80 : vector<8x128xf32>
    %82 = vector.extract_strided_slice %65 {offsets = [0, 256], sizes = [8, 128], strides = [1, 1]} : vector<8x512xf32> to vector<8x128xf32>
    %83 = math.tanh %82 : vector<8x128xf32>
    %84 = vector.extract_strided_slice %65 {offsets = [0, 384], sizes = [8, 128], strides = [1, 1]} : vector<8x512xf32> to vector<8x128xf32>
    %cst_40 = arith.constant 5.000000e-01 : f32
    %85 = vector.broadcast %cst_40 : f32 to vector<8x128xf32>
    %86 = arith.mulf %85, %84 : vector<8x128xf32>
    %87 = math.tanh %86 : vector<8x128xf32>
    %cst_41 = arith.constant 5.000000e-01 : f32
    %88 = vector.broadcast %cst_41 : f32 to vector<8x128xf32>
    %89 = arith.mulf %88, %87 : vector<8x128xf32>
    %cst_42 = arith.constant 5.000000e-01 : f32
    %90 = vector.broadcast %cst_42 : f32 to vector<8x128xf32>
    %91 = arith.addf %89, %90 : vector<8x128xf32>
    %92 = arith.mulf %81, %57 : vector<8x128xf32>
    %93 = arith.mulf %73, %83 : vector<8x128xf32>
    %94 = arith.addf %92, %93 : vector<8x128xf32>
    %95 = math.tanh %94 : vector<8x128xf32>
    %96 = arith.mulf %91, %95 : vector<8x128xf32>
    %c8_i32_43 = arith.constant 8 : i32
    %97 = arith.muli %arg1, %c8_i32_43 : i32
    %98 = arith.addi %97, %c1_i32 : i32
    %c8_i32_44 = arith.constant 8 : i32
    %99 = arith.cmpi slt, %98, %c8_i32_44 : i32
    %100 = arith.select %99, %96, %56 : vector<8x128xf32>
    %101 = arith.select %99, %94, %57 : vector<8x128xf32>
    %c2_i32 = arith.constant 2 : i32
    %102 = arith.truncf %100 : vector<8x128xf32> to vector<8x128xbf16>
    %c0_45 = arith.constant 0 : index
    %c0_46 = arith.constant 0 : index
    %103 = vector.load %arg4[%c0_45, %c0_46] : memref<128x512xbf16, #tpu.memory_space<vmem>>, vector<128x512xbf16>
    %cst_47 = arith.constant dense<0.000000e+00> : vector<8x512xf32>
    %104 = tpu.matmul %102, %103, %cst_47 {dimension_numbers = #tpu.dot_dimension_numbers<[1], [0], [0], [1], [0, 0, 1, 1], [], []>} : vector<8x128xbf16>, vector<128x512xbf16>, vector<8x512xf32> -> vector<8x512xf32>
    %c8_i32_48 = arith.constant 8 : i32
    %105 = arith.muli %c2_i32, %c8_i32_48 : i32
    %106 = tpu.assume_multiple %105, 8 : i32
    %107 = arith.index_cast %106 : i32 to index
    %c0_49 = arith.constant 0 : index
    %108 = vector.load %arg13[%107, %c0_49] : memref<64x512xf32, #tpu.memory_space<vmem>>, vector<8x512xf32>
    %109 = arith.addf %108, %104 : vector<8x512xf32>
    %110 = vector.extract_strided_slice %109 {offsets = [0, 0], sizes = [8, 128], strides = [1, 1]} : vector<8x512xf32> to vector<8x128xf32>
    %cst_50 = arith.constant 5.000000e-01 : f32
    %111 = vector.broadcast %cst_50 : f32 to vector<8x128xf32>
    %112 = arith.mulf %111, %110 : vector<8x128xf32>
    %113 = math.tanh %112 : vector<8x128xf32>
    %cst_51 = arith.constant 5.000000e-01 : f32
    %114 = vector.broadcast %cst_51 : f32 to vector<8x128xf32>
    %115 = arith.mulf %114, %113 : vector<8x128xf32>
    %cst_52 = arith.constant 5.000000e-01 : f32
    %116 = vector.broadcast %cst_52 : f32 to vector<8x128xf32>
    %117 = arith.addf %115, %116 : vector<8x128xf32>
    %118 = vector.extract_strided_slice %109 {offsets = [0, 128], sizes = [8, 128], strides = [1, 1]} : vector<8x512xf32> to vector<8x128xf32>
    %cst_53 = arith.constant 5.000000e-01 : f32
    %119 = vector.broadcast %cst_53 : f32 to vector<8x128xf32>
    %120 = arith.mulf %119, %118 : vector<8x128xf32>
    %121 = math.tanh %120 : vector<8x128xf32>
    %cst_54 = arith.constant 5.000000e-01 : f32
    %122 = vector.broadcast %cst_54 : f32 to vector<8x128xf32>
    %123 = arith.mulf %122, %121 : vector<8x128xf32>
    %cst_55 = arith.constant 5.000000e-01 : f32
    %124 = vector.broadcast %cst_55 : f32 to vector<8x128xf32>
    %125 = arith.addf %123, %124 : vector<8x128xf32>
    %126 = vector.extract_strided_slice %109 {offsets = [0, 256], sizes = [8, 128], strides = [1, 1]} : vector<8x512xf32> to vector<8x128xf32>
    %127 = math.tanh %126 : vector<8x128xf32>
    %128 = vector.extract_strided_slice %109 {offsets = [0, 384], sizes = [8, 128], strides = [1, 1]} : vector<8x512xf32> to vector<8x128xf32>
    %cst_56 = arith.constant 5.000000e-01 : f32
    %129 = vector.broadcast %cst_56 : f32 to vector<8x128xf32>
    %130 = arith.mulf %129, %128 : vector<8x128xf32>
    %131 = math.tanh %130 : vector<8x128xf32>
    %cst_57 = arith.constant 5.000000e-01 : f32
    %132 = vector.broadcast %cst_57 : f32 to vector<8x128xf32>
    %133 = arith.mulf %132, %131 : vector<8x128xf32>
    %cst_58 = arith.constant 5.000000e-01 : f32
    %134 = vector.broadcast %cst_58 : f32 to vector<8x128xf32>
    %135 = arith.addf %133, %134 : vector<8x128xf32>
    %136 = arith.mulf %125, %101 : vector<8x128xf32>
    %137 = arith.mulf %117, %127 : vector<8x128xf32>
    %138 = arith.addf %136, %137 : vector<8x128xf32>
    %139 = math.tanh %138 : vector<8x128xf32>
    %140 = arith.mulf %135, %139 : vector<8x128xf32>
    %c8_i32_59 = arith.constant 8 : i32
    %141 = arith.muli %arg1, %c8_i32_59 : i32
    %142 = arith.addi %141, %c2_i32 : i32
    %c8_i32_60 = arith.constant 8 : i32
    %143 = arith.cmpi slt, %142, %c8_i32_60 : i32
    %144 = arith.select %143, %140, %100 : vector<8x128xf32>
    %145 = arith.select %143, %138, %101 : vector<8x128xf32>
    %c3_i32 = arith.constant 3 : i32
    %146 = arith.truncf %144 : vector<8x128xf32> to vector<8x128xbf16>
    %c0_61 = arith.constant 0 : index
    %c0_62 = arith.constant 0 : index
    %147 = vector.load %arg4[%c0_61, %c0_62] : memref<128x512xbf16, #tpu.memory_space<vmem>>, vector<128x512xbf16>
    %cst_63 = arith.constant dense<0.000000e+00> : vector<8x512xf32>
    %148 = tpu.matmul %146, %147, %cst_63 {dimension_numbers = #tpu.dot_dimension_numbers<[1], [0], [0], [1], [0, 0, 1, 1], [], []>} : vector<8x128xbf16>, vector<128x512xbf16>, vector<8x512xf32> -> vector<8x512xf32>
    %c8_i32_64 = arith.constant 8 : i32
    %149 = arith.muli %c3_i32, %c8_i32_64 : i32
    %150 = tpu.assume_multiple %149, 8 : i32
    %151 = arith.index_cast %150 : i32 to index
    %c0_65 = arith.constant 0 : index
    %152 = vector.load %arg13[%151, %c0_65] : memref<64x512xf32, #tpu.memory_space<vmem>>, vector<8x512xf32>
    %153 = arith.addf %152, %148 : vector<8x512xf32>
    %154 = vector.extract_strided_slice %153 {offsets = [0, 0], sizes = [8, 128], strides = [1, 1]} : vector<8x512xf32> to vector<8x128xf32>
    %cst_66 = arith.constant 5.000000e-01 : f32
    %155 = vector.broadcast %cst_66 : f32 to vector<8x128xf32>
    %156 = arith.mulf %155, %154 : vector<8x128xf32>
    %157 = math.tanh %156 : vector<8x128xf32>
    %cst_67 = arith.constant 5.000000e-01 : f32
    %158 = vector.broadcast %cst_67 : f32 to vector<8x128xf32>
    %159 = arith.mulf %158, %157 : vector<8x128xf32>
    %cst_68 = arith.constant 5.000000e-01 : f32
    %160 = vector.broadcast %cst_68 : f32 to vector<8x128xf32>
    %161 = arith.addf %159, %160 : vector<8x128xf32>
    %162 = vector.extract_strided_slice %153 {offsets = [0, 128], sizes = [8, 128], strides = [1, 1]} : vector<8x512xf32> to vector<8x128xf32>
    %cst_69 = arith.constant 5.000000e-01 : f32
    %163 = vector.broadcast %cst_69 : f32 to vector<8x128xf32>
    %164 = arith.mulf %163, %162 : vector<8x128xf32>
    %165 = math.tanh %164 : vector<8x128xf32>
    %cst_70 = arith.constant 5.000000e-01 : f32
    %166 = vector.broadcast %cst_70 : f32 to vector<8x128xf32>
    %167 = arith.mulf %166, %165 : vector<8x128xf32>
    %cst_71 = arith.constant 5.000000e-01 : f32
    %168 = vector.broadcast %cst_71 : f32 to vector<8x128xf32>
    %169 = arith.addf %167, %168 : vector<8x128xf32>
    %170 = vector.extract_strided_slice %153 {offsets = [0, 256], sizes = [8, 128], strides = [1, 1]} : vector<8x512xf32> to vector<8x128xf32>
    %171 = math.tanh %170 : vector<8x128xf32>
    %172 = vector.extract_strided_slice %153 {offsets = [0, 384], sizes = [8, 128], strides = [1, 1]} : vector<8x512xf32> to vector<8x128xf32>
    %cst_72 = arith.constant 5.000000e-01 : f32
    %173 = vector.broadcast %cst_72 : f32 to vector<8x128xf32>
    %174 = arith.mulf %173, %172 : vector<8x128xf32>
    %175 = math.tanh %174 : vector<8x128xf32>
    %cst_73 = arith.constant 5.000000e-01 : f32
    %176 = vector.broadcast %cst_73 : f32 to vector<8x128xf32>
    %177 = arith.mulf %176, %175 : vector<8x128xf32>
    %cst_74 = arith.constant 5.000000e-01 : f32
    %178 = vector.broadcast %cst_74 : f32 to vector<8x128xf32>
    %179 = arith.addf %177, %178 : vector<8x128xf32>
    %180 = arith.mulf %169, %145 : vector<8x128xf32>
    %181 = arith.mulf %161, %171 : vector<8x128xf32>
    %182 = arith.addf %180, %181 : vector<8x128xf32>
    %183 = math.tanh %182 : vector<8x128xf32>
    %184 = arith.mulf %179, %183 : vector<8x128xf32>
    %c8_i32_75 = arith.constant 8 : i32
    %185 = arith.muli %arg1, %c8_i32_75 : i32
    %186 = arith.addi %185, %c3_i32 : i32
    %c8_i32_76 = arith.constant 8 : i32
    %187 = arith.cmpi slt, %186, %c8_i32_76 : i32
    %188 = arith.select %187, %184, %144 : vector<8x128xf32>
    %189 = arith.select %187, %182, %145 : vector<8x128xf32>
    %c4_i32 = arith.constant 4 : i32
    %190 = arith.truncf %188 : vector<8x128xf32> to vector<8x128xbf16>
    %c0_77 = arith.constant 0 : index
    %c0_78 = arith.constant 0 : index
    %191 = vector.load %arg4[%c0_77, %c0_78] : memref<128x512xbf16, #tpu.memory_space<vmem>>, vector<128x512xbf16>
    %cst_79 = arith.constant dense<0.000000e+00> : vector<8x512xf32>
    %192 = tpu.matmul %190, %191, %cst_79 {dimension_numbers = #tpu.dot_dimension_numbers<[1], [0], [0], [1], [0, 0, 1, 1], [], []>} : vector<8x128xbf16>, vector<128x512xbf16>, vector<8x512xf32> -> vector<8x512xf32>
    %c8_i32_80 = arith.constant 8 : i32
    %193 = arith.muli %c4_i32, %c8_i32_80 : i32
    %194 = tpu.assume_multiple %193, 8 : i32
    %195 = arith.index_cast %194 : i32 to index
    %c0_81 = arith.constant 0 : index
    %196 = vector.load %arg13[%195, %c0_81] : memref<64x512xf32, #tpu.memory_space<vmem>>, vector<8x512xf32>
    %197 = arith.addf %196, %192 : vector<8x512xf32>
    %198 = vector.extract_strided_slice %197 {offsets = [0, 0], sizes = [8, 128], strides = [1, 1]} : vector<8x512xf32> to vector<8x128xf32>
    %cst_82 = arith.constant 5.000000e-01 : f32
    %199 = vector.broadcast %cst_82 : f32 to vector<8x128xf32>
    %200 = arith.mulf %199, %198 : vector<8x128xf32>
    %201 = math.tanh %200 : vector<8x128xf32>
    %cst_83 = arith.constant 5.000000e-01 : f32
    %202 = vector.broadcast %cst_83 : f32 to vector<8x128xf32>
    %203 = arith.mulf %202, %201 : vector<8x128xf32>
    %cst_84 = arith.constant 5.000000e-01 : f32
    %204 = vector.broadcast %cst_84 : f32 to vector<8x128xf32>
    %205 = arith.addf %203, %204 : vector<8x128xf32>
    %206 = vector.extract_strided_slice %197 {offsets = [0, 128], sizes = [8, 128], strides = [1, 1]} : vector<8x512xf32> to vector<8x128xf32>
    %cst_85 = arith.constant 5.000000e-01 : f32
    %207 = vector.broadcast %cst_85 : f32 to vector<8x128xf32>
    %208 = arith.mulf %207, %206 : vector<8x128xf32>
    %209 = math.tanh %208 : vector<8x128xf32>
    %cst_86 = arith.constant 5.000000e-01 : f32
    %210 = vector.broadcast %cst_86 : f32 to vector<8x128xf32>
    %211 = arith.mulf %210, %209 : vector<8x128xf32>
    %cst_87 = arith.constant 5.000000e-01 : f32
    %212 = vector.broadcast %cst_87 : f32 to vector<8x128xf32>
    %213 = arith.addf %211, %212 : vector<8x128xf32>
    %214 = vector.extract_strided_slice %197 {offsets = [0, 256], sizes = [8, 128], strides = [1, 1]} : vector<8x512xf32> to vector<8x128xf32>
    %215 = math.tanh %214 : vector<8x128xf32>
    %216 = vector.extract_strided_slice %197 {offsets = [0, 384], sizes = [8, 128], strides = [1, 1]} : vector<8x512xf32> to vector<8x128xf32>
    %cst_88 = arith.constant 5.000000e-01 : f32
    %217 = vector.broadcast %cst_88 : f32 to vector<8x128xf32>
    %218 = arith.mulf %217, %216 : vector<8x128xf32>
    %219 = math.tanh %218 : vector<8x128xf32>
    %cst_89 = arith.constant 5.000000e-01 : f32
    %220 = vector.broadcast %cst_89 : f32 to vector<8x128xf32>
    %221 = arith.mulf %220, %219 : vector<8x128xf32>
    %cst_90 = arith.constant 5.000000e-01 : f32
    %222 = vector.broadcast %cst_90 : f32 to vector<8x128xf32>
    %223 = arith.addf %221, %222 : vector<8x128xf32>
    %224 = arith.mulf %213, %189 : vector<8x128xf32>
    %225 = arith.mulf %205, %215 : vector<8x128xf32>
    %226 = arith.addf %224, %225 : vector<8x128xf32>
    %227 = math.tanh %226 : vector<8x128xf32>
    %228 = arith.mulf %223, %227 : vector<8x128xf32>
    %c8_i32_91 = arith.constant 8 : i32
    %229 = arith.muli %arg1, %c8_i32_91 : i32
    %230 = arith.addi %229, %c4_i32 : i32
    %c8_i32_92 = arith.constant 8 : i32
    %231 = arith.cmpi slt, %230, %c8_i32_92 : i32
    %232 = arith.select %231, %228, %188 : vector<8x128xf32>
    %233 = arith.select %231, %226, %189 : vector<8x128xf32>
    %c5_i32 = arith.constant 5 : i32
    %234 = arith.truncf %232 : vector<8x128xf32> to vector<8x128xbf16>
    %c0_93 = arith.constant 0 : index
    %c0_94 = arith.constant 0 : index
    %235 = vector.load %arg4[%c0_93, %c0_94] : memref<128x512xbf16, #tpu.memory_space<vmem>>, vector<128x512xbf16>
    %cst_95 = arith.constant dense<0.000000e+00> : vector<8x512xf32>
    %236 = tpu.matmul %234, %235, %cst_95 {dimension_numbers = #tpu.dot_dimension_numbers<[1], [0], [0], [1], [0, 0, 1, 1], [], []>} : vector<8x128xbf16>, vector<128x512xbf16>, vector<8x512xf32> -> vector<8x512xf32>
    %c8_i32_96 = arith.constant 8 : i32
    %237 = arith.muli %c5_i32, %c8_i32_96 : i32
    %238 = tpu.assume_multiple %237, 8 : i32
    %239 = arith.index_cast %238 : i32 to index
    %c0_97 = arith.constant 0 : index
    %240 = vector.load %arg13[%239, %c0_97] : memref<64x512xf32, #tpu.memory_space<vmem>>, vector<8x512xf32>
    %241 = arith.addf %240, %236 : vector<8x512xf32>
    %242 = vector.extract_strided_slice %241 {offsets = [0, 0], sizes = [8, 128], strides = [1, 1]} : vector<8x512xf32> to vector<8x128xf32>
    %cst_98 = arith.constant 5.000000e-01 : f32
    %243 = vector.broadcast %cst_98 : f32 to vector<8x128xf32>
    %244 = arith.mulf %243, %242 : vector<8x128xf32>
    %245 = math.tanh %244 : vector<8x128xf32>
    %cst_99 = arith.constant 5.000000e-01 : f32
    %246 = vector.broadcast %cst_99 : f32 to vector<8x128xf32>
    %247 = arith.mulf %246, %245 : vector<8x128xf32>
    %cst_100 = arith.constant 5.000000e-01 : f32
    %248 = vector.broadcast %cst_100 : f32 to vector<8x128xf32>
    %249 = arith.addf %247, %248 : vector<8x128xf32>
    %250 = vector.extract_strided_slice %241 {offsets = [0, 128], sizes = [8, 128], strides = [1, 1]} : vector<8x512xf32> to vector<8x128xf32>
    %cst_101 = arith.constant 5.000000e-01 : f32
    %251 = vector.broadcast %cst_101 : f32 to vector<8x128xf32>
    %252 = arith.mulf %251, %250 : vector<8x128xf32>
    %253 = math.tanh %252 : vector<8x128xf32>
    %cst_102 = arith.constant 5.000000e-01 : f32
    %254 = vector.broadcast %cst_102 : f32 to vector<8x128xf32>
    %255 = arith.mulf %254, %253 : vector<8x128xf32>
    %cst_103 = arith.constant 5.000000e-01 : f32
    %256 = vector.broadcast %cst_103 : f32 to vector<8x128xf32>
    %257 = arith.addf %255, %256 : vector<8x128xf32>
    %258 = vector.extract_strided_slice %241 {offsets = [0, 256], sizes = [8, 128], strides = [1, 1]} : vector<8x512xf32> to vector<8x128xf32>
    %259 = math.tanh %258 : vector<8x128xf32>
    %260 = vector.extract_strided_slice %241 {offsets = [0, 384], sizes = [8, 128], strides = [1, 1]} : vector<8x512xf32> to vector<8x128xf32>
    %cst_104 = arith.constant 5.000000e-01 : f32
    %261 = vector.broadcast %cst_104 : f32 to vector<8x128xf32>
    %262 = arith.mulf %261, %260 : vector<8x128xf32>
    %263 = math.tanh %262 : vector<8x128xf32>
    %cst_105 = arith.constant 5.000000e-01 : f32
    %264 = vector.broadcast %cst_105 : f32 to vector<8x128xf32>
    %265 = arith.mulf %264, %263 : vector<8x128xf32>
    %cst_106 = arith.constant 5.000000e-01 : f32
    %266 = vector.broadcast %cst_106 : f32 to vector<8x128xf32>
    %267 = arith.addf %265, %266 : vector<8x128xf32>
    %268 = arith.mulf %257, %233 : vector<8x128xf32>
    %269 = arith.mulf %249, %259 : vector<8x128xf32>
    %270 = arith.addf %268, %269 : vector<8x128xf32>
    %271 = math.tanh %270 : vector<8x128xf32>
    %272 = arith.mulf %267, %271 : vector<8x128xf32>
    %c8_i32_107 = arith.constant 8 : i32
    %273 = arith.muli %arg1, %c8_i32_107 : i32
    %274 = arith.addi %273, %c5_i32 : i32
    %c8_i32_108 = arith.constant 8 : i32
    %275 = arith.cmpi slt, %274, %c8_i32_108 : i32
    %276 = arith.select %275, %272, %232 : vector<8x128xf32>
    %277 = arith.select %275, %270, %233 : vector<8x128xf32>
    %c6_i32 = arith.constant 6 : i32
    %278 = arith.truncf %276 : vector<8x128xf32> to vector<8x128xbf16>
    %c0_109 = arith.constant 0 : index
    %c0_110 = arith.constant 0 : index
    %279 = vector.load %arg4[%c0_109, %c0_110] : memref<128x512xbf16, #tpu.memory_space<vmem>>, vector<128x512xbf16>
    %cst_111 = arith.constant dense<0.000000e+00> : vector<8x512xf32>
    %280 = tpu.matmul %278, %279, %cst_111 {dimension_numbers = #tpu.dot_dimension_numbers<[1], [0], [0], [1], [0, 0, 1, 1], [], []>} : vector<8x128xbf16>, vector<128x512xbf16>, vector<8x512xf32> -> vector<8x512xf32>
    %c8_i32_112 = arith.constant 8 : i32
    %281 = arith.muli %c6_i32, %c8_i32_112 : i32
    %282 = tpu.assume_multiple %281, 8 : i32
    %283 = arith.index_cast %282 : i32 to index
    %c0_113 = arith.constant 0 : index
    %284 = vector.load %arg13[%283, %c0_113] : memref<64x512xf32, #tpu.memory_space<vmem>>, vector<8x512xf32>
    %285 = arith.addf %284, %280 : vector<8x512xf32>
    %286 = vector.extract_strided_slice %285 {offsets = [0, 0], sizes = [8, 128], strides = [1, 1]} : vector<8x512xf32> to vector<8x128xf32>
    %cst_114 = arith.constant 5.000000e-01 : f32
    %287 = vector.broadcast %cst_114 : f32 to vector<8x128xf32>
    %288 = arith.mulf %287, %286 : vector<8x128xf32>
    %289 = math.tanh %288 : vector<8x128xf32>
    %cst_115 = arith.constant 5.000000e-01 : f32
    %290 = vector.broadcast %cst_115 : f32 to vector<8x128xf32>
    %291 = arith.mulf %290, %289 : vector<8x128xf32>
    %cst_116 = arith.constant 5.000000e-01 : f32
    %292 = vector.broadcast %cst_116 : f32 to vector<8x128xf32>
    %293 = arith.addf %291, %292 : vector<8x128xf32>
    %294 = vector.extract_strided_slice %285 {offsets = [0, 128], sizes = [8, 128], strides = [1, 1]} : vector<8x512xf32> to vector<8x128xf32>
    %cst_117 = arith.constant 5.000000e-01 : f32
    %295 = vector.broadcast %cst_117 : f32 to vector<8x128xf32>
    %296 = arith.mulf %295, %294 : vector<8x128xf32>
    %297 = math.tanh %296 : vector<8x128xf32>
    %cst_118 = arith.constant 5.000000e-01 : f32
    %298 = vector.broadcast %cst_118 : f32 to vector<8x128xf32>
    %299 = arith.mulf %298, %297 : vector<8x128xf32>
    %cst_119 = arith.constant 5.000000e-01 : f32
    %300 = vector.broadcast %cst_119 : f32 to vector<8x128xf32>
    %301 = arith.addf %299, %300 : vector<8x128xf32>
    %302 = vector.extract_strided_slice %285 {offsets = [0, 256], sizes = [8, 128], strides = [1, 1]} : vector<8x512xf32> to vector<8x128xf32>
    %303 = math.tanh %302 : vector<8x128xf32>
    %304 = vector.extract_strided_slice %285 {offsets = [0, 384], sizes = [8, 128], strides = [1, 1]} : vector<8x512xf32> to vector<8x128xf32>
    %cst_120 = arith.constant 5.000000e-01 : f32
    %305 = vector.broadcast %cst_120 : f32 to vector<8x128xf32>
    %306 = arith.mulf %305, %304 : vector<8x128xf32>
    %307 = math.tanh %306 : vector<8x128xf32>
    %cst_121 = arith.constant 5.000000e-01 : f32
    %308 = vector.broadcast %cst_121 : f32 to vector<8x128xf32>
    %309 = arith.mulf %308, %307 : vector<8x128xf32>
    %cst_122 = arith.constant 5.000000e-01 : f32
    %310 = vector.broadcast %cst_122 : f32 to vector<8x128xf32>
    %311 = arith.addf %309, %310 : vector<8x128xf32>
    %312 = arith.mulf %301, %277 : vector<8x128xf32>
    %313 = arith.mulf %293, %303 : vector<8x128xf32>
    %314 = arith.addf %312, %313 : vector<8x128xf32>
    %315 = math.tanh %314 : vector<8x128xf32>
    %316 = arith.mulf %311, %315 : vector<8x128xf32>
    %c8_i32_123 = arith.constant 8 : i32
    %317 = arith.muli %arg1, %c8_i32_123 : i32
    %318 = arith.addi %317, %c6_i32 : i32
    %c8_i32_124 = arith.constant 8 : i32
    %319 = arith.cmpi slt, %318, %c8_i32_124 : i32
    %320 = arith.select %319, %316, %276 : vector<8x128xf32>
    %321 = arith.select %319, %314, %277 : vector<8x128xf32>
    %c7_i32 = arith.constant 7 : i32
    %322 = arith.truncf %320 : vector<8x128xf32> to vector<8x128xbf16>
    %c0_125 = arith.constant 0 : index
    %c0_126 = arith.constant 0 : index
    %323 = vector.load %arg4[%c0_125, %c0_126] : memref<128x512xbf16, #tpu.memory_space<vmem>>, vector<128x512xbf16>
    %cst_127 = arith.constant dense<0.000000e+00> : vector<8x512xf32>
    %324 = tpu.matmul %322, %323, %cst_127 {dimension_numbers = #tpu.dot_dimension_numbers<[1], [0], [0], [1], [0, 0, 1, 1], [], []>} : vector<8x128xbf16>, vector<128x512xbf16>, vector<8x512xf32> -> vector<8x512xf32>
    %c8_i32_128 = arith.constant 8 : i32
    %325 = arith.muli %c7_i32, %c8_i32_128 : i32
    %326 = tpu.assume_multiple %325, 8 : i32
    %327 = arith.index_cast %326 : i32 to index
    %c0_129 = arith.constant 0 : index
    %328 = vector.load %arg13[%327, %c0_129] : memref<64x512xf32, #tpu.memory_space<vmem>>, vector<8x512xf32>
    %329 = arith.addf %328, %324 : vector<8x512xf32>
    %330 = vector.extract_strided_slice %329 {offsets = [0, 0], sizes = [8, 128], strides = [1, 1]} : vector<8x512xf32> to vector<8x128xf32>
    %cst_130 = arith.constant 5.000000e-01 : f32
    %331 = vector.broadcast %cst_130 : f32 to vector<8x128xf32>
    %332 = arith.mulf %331, %330 : vector<8x128xf32>
    %333 = math.tanh %332 : vector<8x128xf32>
    %cst_131 = arith.constant 5.000000e-01 : f32
    %334 = vector.broadcast %cst_131 : f32 to vector<8x128xf32>
    %335 = arith.mulf %334, %333 : vector<8x128xf32>
    %cst_132 = arith.constant 5.000000e-01 : f32
    %336 = vector.broadcast %cst_132 : f32 to vector<8x128xf32>
    %337 = arith.addf %335, %336 : vector<8x128xf32>
    %338 = vector.extract_strided_slice %329 {offsets = [0, 128], sizes = [8, 128], strides = [1, 1]} : vector<8x512xf32> to vector<8x128xf32>
    %cst_133 = arith.constant 5.000000e-01 : f32
    %339 = vector.broadcast %cst_133 : f32 to vector<8x128xf32>
    %340 = arith.mulf %339, %338 : vector<8x128xf32>
    %341 = math.tanh %340 : vector<8x128xf32>
    %cst_134 = arith.constant 5.000000e-01 : f32
    %342 = vector.broadcast %cst_134 : f32 to vector<8x128xf32>
    %343 = arith.mulf %342, %341 : vector<8x128xf32>
    %cst_135 = arith.constant 5.000000e-01 : f32
    %344 = vector.broadcast %cst_135 : f32 to vector<8x128xf32>
    %345 = arith.addf %343, %344 : vector<8x128xf32>
    %346 = vector.extract_strided_slice %329 {offsets = [0, 256], sizes = [8, 128], strides = [1, 1]} : vector<8x512xf32> to vector<8x128xf32>
    %347 = math.tanh %346 : vector<8x128xf32>
    %348 = vector.extract_strided_slice %329 {offsets = [0, 384], sizes = [8, 128], strides = [1, 1]} : vector<8x512xf32> to vector<8x128xf32>
    %cst_136 = arith.constant 5.000000e-01 : f32
    %349 = vector.broadcast %cst_136 : f32 to vector<8x128xf32>
    %350 = arith.mulf %349, %348 : vector<8x128xf32>
    %351 = math.tanh %350 : vector<8x128xf32>
    %cst_137 = arith.constant 5.000000e-01 : f32
    %352 = vector.broadcast %cst_137 : f32 to vector<8x128xf32>
    %353 = arith.mulf %352, %351 : vector<8x128xf32>
    %cst_138 = arith.constant 5.000000e-01 : f32
    %354 = vector.broadcast %cst_138 : f32 to vector<8x128xf32>
    %355 = arith.addf %353, %354 : vector<8x128xf32>
    %356 = arith.mulf %345, %321 : vector<8x128xf32>
    %357 = arith.mulf %337, %347 : vector<8x128xf32>
    %358 = arith.addf %356, %357 : vector<8x128xf32>
    %359 = math.tanh %358 : vector<8x128xf32>
    %360 = arith.mulf %355, %359 : vector<8x128xf32>
    %c8_i32_139 = arith.constant 8 : i32
    %361 = arith.muli %arg1, %c8_i32_139 : i32
    %362 = arith.addi %361, %c7_i32 : i32
    %c8_i32_140 = arith.constant 8 : i32
    %363 = arith.cmpi slt, %362, %c8_i32_140 : i32
    %364 = arith.select %363, %360, %320 : vector<8x128xf32>
    %365 = arith.select %363, %358, %321 : vector<8x128xf32>
    %c8_i32_141 = arith.constant 8 : i32
    %c0_142 = arith.constant 0 : index
    %c0_143 = arith.constant 0 : index
    %366 = vector.load %arg14[%c0_142, %c0_143] : memref<8x128xf32, #tpu.memory_space<vmem>>, vector<8x128xf32>
    tpu.vector_store %arg14[%c0_142, %c0_143], %364 {strides = array<i32>} : memref<8x128xf32, #tpu.memory_space<vmem>>, vector<8x128xf32>,
    %c0_144 = arith.constant 0 : index
    %c0_145 = arith.constant 0 : index
    %367 = vector.load %arg15[%c0_144, %c0_145] : memref<8x128xf32, #tpu.memory_space<vmem>>, vector<8x128xf32>
    tpu.vector_store %arg15[%c0_144, %c0_145], %365 {strides = array<i32>} : memref<8x128xf32, #tpu.memory_space<vmem>>, vector<8x128xf32>,
    %c0_i32_146 = arith.constant 0 : i32
    %368 = arith.cmpi eq, %arg1, %c0_i32_146 : i32
    %369 = arith.extui %368 : i1 to i32
    %c0_i32_147 = arith.constant 0 : i32
    %370 = arith.cmpi ne, %369, %c0_i32_147 : i32
    scf.if %370 {
      %371 = arith.truncf %364 : vector<8x128xf32> to vector<8x128xbf16>
      %c0_148 = arith.constant 0 : index
      %c0_149 = arith.constant 0 : index
      %372 = vector.load %arg6[%c0_148, %c0_149] : memref<128x192xbf16, #tpu.memory_space<vmem>>, vector<128x192xbf16>
      %cst_150 = arith.constant dense<0.000000e+00> : vector<8x192xf32>
      %373 = tpu.matmul %371, %372, %cst_150 {dimension_numbers = #tpu.dot_dimension_numbers<[1], [0], [0], [1], [0, 0, 1, 1], [], []>} : vector<8x128xbf16>, vector<128x192xbf16>, vector<8x192xf32> -> vector<8x192xf32>
      %c0_151 = arith.constant 0 : index
      %c0_152 = arith.constant 0 : index
      %374 = vector.load %arg7[%c0_151, %c0_152] : memref<1x192xf32, #tpu.memory_space<vmem>>, vector<1x192xf32>
      %375 = vector.broadcast %374 : vector<1x192xf32> to vector<8x192xf32>
      %376 = arith.addf %373, %375 : vector<8x192xf32>
      %377 = vector.extract_strided_slice %376 {offsets = [0, 0], sizes = [8, 64], strides = [1, 1]} : vector<8x192xf32> to vector<8x64xf32>
      %cst_153 = arith.constant 5.000000e-01 : f32
      %378 = vector.broadcast %cst_153 : f32 to vector<8x64xf32>
      %379 = arith.mulf %378, %377 : vector<8x64xf32>
      %380 = math.tanh %379 : vector<8x64xf32>
      %cst_154 = arith.constant 5.000000e-01 : f32
      %381 = vector.broadcast %cst_154 : f32 to vector<8x64xf32>
      %382 = arith.mulf %381, %380 : vector<8x64xf32>
      %cst_155 = arith.constant 5.000000e-01 : f32
      %383 = vector.broadcast %cst_155 : f32 to vector<8x64xf32>
      %384 = arith.addf %382, %383 : vector<8x64xf32>
      %385 = vector.extract_strided_slice %376 {offsets = [0, 64], sizes = [8, 64], strides = [1, 1]} : vector<8x192xf32> to vector<8x64xf32>
      %386 = math.tanh %385 : vector<8x64xf32>
      %387 = vector.extract_strided_slice %376 {offsets = [0, 128], sizes = [8, 64], strides = [1, 1]} : vector<8x192xf32> to vector<8x64xf32>
      %cst_156 = arith.constant 5.000000e-01 : f32
      %388 = vector.broadcast %cst_156 : f32 to vector<8x64xf32>
      %389 = arith.mulf %388, %387 : vector<8x64xf32>
      %390 = math.tanh %389 : vector<8x64xf32>
      %cst_157 = arith.constant 5.000000e-01 : f32
      %391 = vector.broadcast %cst_157 : f32 to vector<8x64xf32>
      %392 = arith.mulf %391, %390 : vector<8x64xf32>
      %cst_158 = arith.constant 5.000000e-01 : f32
      %393 = vector.broadcast %cst_158 : f32 to vector<8x64xf32>
      %394 = arith.addf %392, %393 : vector<8x64xf32>
      %395 = arith.mulf %384, %386 : vector<8x64xf32>
      %396 = math.tanh %395 : vector<8x64xf32>
      %397 = arith.mulf %394, %396 : vector<8x64xf32>
      %398 = arith.truncf %397 : vector<8x64xf32> to vector<8x64xbf16>
      %c0_159 = arith.constant 0 : index
      %c0_160 = arith.constant 0 : index
      %399 = vector.load %arg8[%c0_159, %c0_160] : memref<64x32xbf16, #tpu.memory_space<vmem>>, vector<64x32xbf16>
      %cst_161 = arith.constant dense<0.000000e+00> : vector<8x32xf32>
      %400 = tpu.matmul %398, %399, %cst_161 {dimension_numbers = #tpu.dot_dimension_numbers<[1], [0], [0], [1], [0, 0, 1, 1], [], []>} : vector<8x64xbf16>, vector<64x32xbf16>, vector<8x32xf32> -> vector<8x32xf32>
      %c0_162 = arith.constant 0 : index
      %c0_163 = arith.constant 0 : index
      %401 = vector.load %arg9[%c0_162, %c0_163] : memref<1x32xf32, #tpu.memory_space<vmem>>, vector<1x32xf32>
      %402 = vector.broadcast %401 : vector<1x32xf32> to vector<8x32xf32>
      %403 = arith.addf %400, %402 : vector<8x32xf32>
      %cst_164 = arith.constant 0.000000e+00 : f32
      %404 = vector.broadcast %cst_164 : f32 to vector<8x32xf32>
      %405 = arith.maximumf %403, %404 : vector<8x32xf32>
      %406 = arith.truncf %405 : vector<8x32xf32> to vector<8x32xbf16>
      %c0_165 = arith.constant 0 : index
      %c0_166 = arith.constant 0 : index
      %407 = vector.load %arg10[%c0_165, %c0_166] : memref<32x128xbf16, #tpu.memory_space<vmem>>, vector<32x128xbf16>
      %cst_167 = arith.constant dense<0.000000e+00> : vector<8x128xf32>
      %408 = tpu.matmul %406, %407, %cst_167 {dimension_numbers = #tpu.dot_dimension_numbers<[1], [0], [0], [1], [0, 0, 1, 1], [], []>} : vector<8x32xbf16>, vector<32x128xbf16>, vector<8x128xf32> -> vector<8x128xf32>
      %c0_168 = arith.constant 0 : index
      %c0_169 = arith.constant 0 : index
      %409 = vector.load %arg11[%c0_168, %c0_169] : memref<1x128xf32, #tpu.memory_space<vmem>>, vector<1x128xf32>
      %410 = vector.broadcast %409 : vector<1x128xf32> to vector<8x128xf32>
      %411 = arith.addf %408, %410 : vector<8x128xf32>
      %cst_170 = arith.constant dense<0xFF800000> : vector<8xf32>
      %412 = vector.multi_reduction <maximumf>, %411, %cst_170 [1] : vector<8x128xf32> to vector<8xf32>
      %413 = vector.shape_cast %412 : vector<8xf32> to vector<8x1xf32>
      %414 = vector.broadcast %413 : vector<8x1xf32> to vector<8x128xf32>
      %415 = arith.subf %411, %414 : vector<8x128xf32>
      %416 = math.exp %415 : vector<8x128xf32>
      %cst_171 = arith.constant dense<0.000000e+00> : vector<8xf32>
      %417 = vector.multi_reduction <add>, %416, %cst_171 [1] : vector<8x128xf32> to vector<8xf32>
      %418 = vector.shape_cast %417 : vector<8xf32> to vector<8x1xf32>
      %419 = math.log %418 : vector<8x1xf32>
      %420 = arith.addf %413, %419 : vector<8x1xf32>
      %421 = vector.broadcast %420 : vector<8x1xf32> to vector<8x128xf32>
      %422 = arith.subf %411, %421 : vector<8x128xf32>
      %c0_172 = arith.constant 0 : index
      %c0_173 = arith.constant 0 : index
      %423 = vector.load %arg12[%c0_172, %c0_173] : memref<8x128xf32, #tpu.memory_space<vmem>>, vector<8x128xf32>
      tpu.vector_store %arg12[%c0_172, %c0_173], %422 {strides = array<i32>} : memref<8x128xf32, #tpu.memory_space<vmem>>, vector<8x128xf32>,
    } else {
    }
    return
  }
  func.func @transform_0(%arg0: i32, %arg1: i32) -> (i32, i32, i32) {
    %c0_i32 = arith.constant 0 : i32
    %c0_i32_0 = arith.constant 0 : i32
    return %arg1, %arg0, %c0_i32 : i32, i32, i32
  }
  func.func @transform_1(%arg0: i32, %arg1: i32) -> (i32, i32) {
    %c0_i32 = arith.constant 0 : i32
    %c0_i32_0 = arith.constant 0 : i32
    %c0_i32_1 = arith.constant 0 : i32
    return %c0_i32, %c0_i32_0 : i32, i32
  }
  func.func @transform_2(%arg0: i32, %arg1: i32) -> (i32, i32) {
    %c0_i32 = arith.constant 0 : i32
    %c0_i32_0 = arith.constant 0 : i32
    %c0_i32_1 = arith.constant 0 : i32
    return %c0_i32, %c0_i32_0 : i32, i32
  }
  func.func @transform_3(%arg0: i32, %arg1: i32) -> (i32, i32) {
    %c0_i32 = arith.constant 0 : i32
    %c0_i32_0 = arith.constant 0 : i32
    %c0_i32_1 = arith.constant 0 : i32
    return %c0_i32, %c0_i32_0 : i32, i32
  }
  func.func @transform_4(%arg0: i32, %arg1: i32) -> (i32, i32) {
    %c0_i32 = arith.constant 0 : i32
    %c0_i32_0 = arith.constant 0 : i32
    %c0_i32_1 = arith.constant 0 : i32
    return %c0_i32, %c0_i32_0 : i32, i32
  }
  func.func @transform_5(%arg0: i32, %arg1: i32) -> (i32, i32) {
    %c0_i32 = arith.constant 0 : i32
    %c0_i32_0 = arith.constant 0 : i32
    %c0_i32_1 = arith.constant 0 : i32
    return %c0_i32, %c0_i32_0 : i32, i32
  }
  func.func @transform_6(%arg0: i32, %arg1: i32) -> (i32, i32) {
    %c0_i32 = arith.constant 0 : i32
    %c0_i32_0 = arith.constant 0 : i32
    %c0_i32_1 = arith.constant 0 : i32
    return %c0_i32, %c0_i32_0 : i32, i32
  }
  func.func @transform_7(%arg0: i32, %arg1: i32) -> (i32, i32) {
    %c0_i32 = arith.constant 0 : i32
    %c0_i32_0 = arith.constant 0 : i32
    %c0_i32_1 = arith.constant 0 : i32
    return %c0_i32, %c0_i32_0 : i32, i32
  }
  func.func @transform_8(%arg0: i32, %arg1: i32) -> (i32, i32) {
    %c0_i32 = arith.constant 0 : i32
    %c0_i32_0 = arith.constant 0 : i32
    %c0_i32_1 = arith.constant 0 : i32
    return %c0_i32, %c0_i32_0 : i32, i32
  }
  func.func @transform_9(%arg0: i32, %arg1: i32) -> (i32, i32) {
    %c0_i32 = arith.constant 0 : i32
    %c0_i32_0 = arith.constant 0 : i32
    %c0_i32_1 = arith.constant 0 : i32
    return %c0_i32, %c0_i32_0 : i32, i32
  }
  func.func @transform_10(%arg0: i32, %arg1: i32) -> (i32, i32) {
    %c0_i32 = arith.constant 0 : i32
    %c0_i32_0 = arith.constant 0 : i32
    return %arg0, %c0_i32 : i32, i32
  }
}

</mosaic_0001>

<bundles_post_ra>
// kernel: lstm_model_forward.1
= control target key start
LH: loop header
LB: loop body
LE: loop exit
PB: predicated region body
PF: predicated region fallthrough
CT: control target
= control target key end

     0   :  { %v3006_v1 = vmov 0   ;;  %vm100_vm0 = vcmask 130048   ;;  %v2096_v49 = vmov 0.0|0.0   ;;  %v60_v50 = vlaneseq  ;;  %s2098_s25 = smov 64   ;;  %s2993_s1 = inlined_call_operand.vmem [shape: bf16[16,512], index: 1, kind: input, shape index: {}]   ;;  %s2994_s0 = inlined_call_operand.vmem [shape: f32[8,8,16], index: 0, kind: input, shape index: {}]   ;;  %s2995_s2 = inlined_call_operand.vmem [shape: bf16[128,512], index: 2, kind: input, shape index: {}]   ;;  %s2996_s3 = inlined_call_operand.vmem [shape: f32[1,512], index: 3, kind: input, shape index: {}]   ;;  %s2997_s4 = inlined_call_operand.vmem [shape: bf16[128,192], index: 4, kind: input, shape index: {}]   ;;  %s2998_s5 = inlined_call_operand.vmem [shape: f32[1,192], index: 5, kind: input, shape index: {}]   ;;  %s2999_s6 = inlined_call_operand.vmem [shape: bf16[64,32], index: 6, kind: input, shape index: {}]   ;;  %s3000_s8 = inlined_call_operand.vmem [shape: bf16[32,128], index: 8, kind: input, shape index: {}]   ;;  %s3001_s7 = inlined_call_operand.vmem [shape: f32[1,32], index: 7, kind: input, shape index: {}]   ;;  %s3002_s9 = inlined_call_operand.vmem [shape: f32[1,128], index: 9, kind: input, shape index: {}]   ;;  %s3003_s10 = inlined_call_operand.vmem [shape: f32[8,128], index: 10, kind: output, shape index: {}]  }
   0x1   :  { %v1887_v0 = vld [vmem:[%s2993_s1 + $0x4] ss:$16 sps:$4 sm:$0xff]   ;;  %145 = vmatprep.mubr.bf16.mxu0 %v3006_v1  ;;  %218 = vmatprep.mubr.bf16.mxu1 %v3006_v1  ;;  %v1889_v2 = vld [vmem:[%s2993_s1 + $0xc] ss:$16 sps:$4 sm:$0xff]   ;;  %v1891_v3 = vld [vmem:[%s2993_s1] ss:$16 sps:$4 sm:$0xff]  }
   0x2   :  { %113 = vmatprep.subr.bf16.mxu0 %v1887_v0  ;;  %v1892_v4 = vld [vmem:[%s2993_s1 + $0x8] ss:$16 sps:$4 sm:$0xff]   ;;  %v42_v5 = vld [vmem:[%s2994_s0] sm:$0xff]  ;;  %186 = vmatprep.subr.bf16.mxu1 %v1889_v2  ;;  %v2183_v9 = vld [vmem:[%s2995_s2 + $0xc] ss:$16 sps:$4 sm:$0xff]   ;;  %v2437_v51 = vshrl.u32 %v60_v50, 7 }
   0x3   :  { %v43_v6 = vld [vmem:[%s2994_s0 + $0x8] sm:$0xff]  ;;  %114 = vmatpush1.bf16.msra.mxu0 %v1891_v3  ;;  %187 = vmatpush1.bf16.msra.mxu1 %v1892_v4  ;;  %v2178_v8 = vld [vmem:[%s2995_s2 + $0x4] ss:$16 sps:$4 sm:$0xff]   ;;  %v2188_v10 = vld [vmem:[%s2995_s2] ss:$16 sps:$4 sm:$0xff]   ;;  %vm2099_vm1 = vmmov 0  }
   0x4   :  { %v50_v7 = vpack.c.bf16 %v43_v6, %v42_v5  ;;  %v2193_v11 = vld [vmem:[%s2995_s2 + $0x8] ss:$16 sps:$4 sm:$0xff]   ;;  %486 = vmatprep.subr.bf16.mxu0 %v2178_v8  ;;  %v2199_v12 = vld [vmem:[%s2995_s2 + $0x24] ss:$16 sps:$4 sm:$0xff]   ;;  %v2206_v13 = vld [vmem:[%s2995_s2 + $0x2c] ss:$16 sps:$4 sm:$0xff]   ;;  %527 = vmatprep.subr.bf16.mxu1 %v2183_v9 }
   0x5   :  { %v2213_v14 = vld [vmem:[%s2995_s2 + $0x20] ss:$16 sps:$4 sm:$0xff]   ;;  %v2218_v15 = vld [vmem:[%s2995_s2 + $0x28] ss:$16 sps:$4 sm:$0xff]   ;;  %v2233_v18 = vld [vmem:[%s2995_s2 + $0x44] ss:$16 sps:$4 sm:$0xff]  }
   0x6   :  { %1788 = vmatmul.mubr.msk.bf16.vlgmr.msra.gmra.mrb[0].mxu0 %vm100_vm0, %v50_v7  ;;  %1792 = vmatmul.mubr.msk.bf16.vlgmr.msra.gmra.mrb[0].mxu1 %vm100_vm0, %v50_v7  ;;  %v44_v16 = vld [vmem:[%s2994_s0 + $0x10] sm:$0xff]  ;;  %v45_v17 = vld [vmem:[%s2994_s0 + $0x18] sm:$0xff]  ;;  %v46_v26 = vld [vmem:[%s2994_s0 + $0x20] sm:$0xff]  ;;  %3010 = vst [vmem:[#allocation5_spill] sm:$0xff] %v2437_v51  ;;  %v70_v52 = vsub.s32 2, %v2437_v51  ;;  %v74_v53 = vsub.s32 3, %v2437_v51 }
   0x7   :  { %487 = vmatpush1.bf16.msra.mxu0 %v2188_v10  ;;  %528 = vmatpush1.bf16.msra.mxu1 %v2193_v11  ;;  %v51_v19 = vpack.c.bf16 %v45_v17, %v44_v16  ;;  %v2239_v20 = vld [vmem:[%s2995_s2 + $0x4c] ss:$16 sps:$4 sm:$0xff]   ;;  %v2244_v21 = vld [vmem:[%s2995_s2 + $0x40] ss:$16 sps:$4 sm:$0xff]   ;;  %v2250_v22 = vld [vmem:[%s2995_s2 + $0x48] ss:$16 sps:$4 sm:$0xff]  }
   0x8   :  { %488 = vmatprep.subr.bf16.mxu0 %v2199_v12  ;;  %529 = vmatprep.subr.bf16.mxu1 %v2206_v13  ;;  %v2257_v23 = vld [vmem:[%s2995_s2 + $0x64] ss:$16 sps:$4 sm:$0xff]   ;;  %v2263_v24 = vld [vmem:[%s2995_s2 + $0x6c] ss:$16 sps:$4 sm:$0xff]   ;;  %v2268_v25 = vld [vmem:[%s2995_s2 + $0x60] ss:$16 sps:$4 sm:$0xff]  }
   0x9   :  { %155 = vmatprep.mubr.bf16.mxu0 %v3006_v1  ;;  %228 = vmatprep.mubr.bf16.mxu1 %v3006_v1  ;;  %v47_v27 = vld [vmem:[%s2994_s0 + $0x28] sm:$0xff]  ;;  %v2290_v29 = vld [vmem:[%s2995_s2 + $0x84] ss:$16 sps:$4 sm:$0xff]   ;;  %v2303_v32 = vld [vmem:[%s2995_s2 + $0x80] ss:$16 sps:$4 sm:$0xff]   ;;  %v3005_v54 = vsub.s32 0, %v2437_v51 }
   0xa   :  { %v2285_v28 = vld [vmem:[%s2995_s2 + $0x68] ss:$16 sps:$4 sm:$0xff]   ;;  %v2297_v30 = vld [vmem:[%s2995_s2 + $0x8c] ss:$16 sps:$4 sm:$0xff]   ;;  %v52_v31 = vpack.c.bf16 %v47_v27, %v46_v26  ;;  %v2315_v34 = vld [vmem:[%s2995_s2 + $0xa4] ss:$16 sps:$4 sm:$0xff]  }
   0xb   :  { %489 = vmatpush1.bf16.msra.mxu0 %v2213_v14  ;;  %530 = vmatpush1.bf16.msra.mxu1 %v2218_v15  ;;  %v2308_v33 = vld [vmem:[%s2995_s2 + $0x88] ss:$16 sps:$4 sm:$0xff]   ;;  %v2321_v35 = vld [vmem:[%s2995_s2 + $0xac] ss:$16 sps:$4 sm:$0xff]   ;;  %v2328_v36 = vld [vmem:[%s2995_s2 + $0xa0] ss:$16 sps:$4 sm:$0xff]  }
   0xc   :  { %490 = vmatprep.subr.bf16.mxu0 %v2233_v18  ;;  %531 = vmatprep.subr.bf16.mxu1 %v2239_v20  ;;  %v2333_v37 = vld [vmem:[%s2995_s2 + $0xa8] ss:$16 sps:$4 sm:$0xff]   ;;  %v48_v38 = vld [vmem:[%s2994_s0 + $0x30] sm:$0xff]  ;;  %v2355_v41 = vld [vmem:[%s2995_s2 + $0xcc] ss:$16 sps:$4 sm:$0xff]   ;;  %v3004_v56 = vsub.s32 1, %v2437_v51 }
   0xd   :  { %v49_v39 = vld [vmem:[%s2994_s0 + $0x38] sm:$0xff]  ;;  %v2348_v40 = vld [vmem:[%s2995_s2 + $0xc4] ss:$16 sps:$4 sm:$0xff]   ;;  %v2361_v43 = vld [vmem:[%s2995_s2 + $0xc0] ss:$16 sps:$4 sm:$0xff]   ;;  %vm1648_vm2 = vcmask 523264  }
   0xe   :  { %1789 = vmatmul.mubr.msk.bf16.gmra.mrb[4].mxu0 %vm100_vm0, %v51_v19  ;;  %1793 = vmatmul.mubr.msk.bf16.gmra.mrb[4].mxu1 %vm100_vm0, %v51_v19  ;;  %v53_v42 = vpack.c.bf16 %v49_v39, %v48_v38  ;;  %v2368_v44 = vld [vmem:[%s2995_s2 + $0xc8] ss:$16 sps:$4 sm:$0xff]   ;;  %v2373_v45 = vld [vmem:[%s2995_s2 + $0xe4] ss:$16 sps:$4 sm:$0xff]   ;;  %v2379_v46 = vld [vmem:[%s2995_s2 + $0xec] ss:$16 sps:$4 sm:$0xff]  }
   0xf   :  { %491 = vmatpush1.bf16.msra.mxu0 %v2244_v21  ;;  %165 = vmatprep.mubr.bf16.mxu0 %v3006_v1  ;;  %v2387_v47 = vld [vmem:[%s2995_s2 + $0xe0] ss:$16 sps:$4 sm:$0xff]   ;;  %v2395_v48 = vld [vmem:[%s2995_s2 + $0xe8] ss:$16 sps:$4 sm:$0xff]   ;;  %vm1717_vm3 = vcmask 261120  }
  0x10   :  { %532 = vmatpush1.bf16.msra.mxu1 %v2250_v22  ;;  %492 = vmatprep.subr.bf16.mxu0 %v2257_v23  ;;  %v58_v55 = vld [vmem:[%s2996_s3] sm:$0xf] }
  0x11   :  { %533 = vmatprep.subr.bf16.mxu1 %v2263_v24  ;;  %238 = vmatprep.mubr.bf16.mxu1 %v3006_v1  ;;  %v2446_v57 = vrot.slane %v58_v55, %v70_v52  ;;  %v2452_v60 = vrot.slane %v58_v55, %v74_v53  ;;  %v63_v61 = vrot.slane %v58_v55, %v3005_v54 }
  0x12   :  { %v67_v0 = vrot.slane %v58_v55, %v3004_v56 }
  0x13   :  { %493 = vmatpush1.bf16.msra.mxu0 %v2268_v25 }
  0x14   :  { %534 = vmatpush1.bf16.msra.mxu1 %v2285_v28  ;;  %494 = vmatprep.subr.bf16.mxu0 %v2290_v29 }
  0x15   :  { %535 = vmatprep.subr.bf16.mxu1 %v2297_v30 }
  0x16   :  { %1790 = vmatmul.mubr.msk.bf16.gmra.mrb[8].mxu0 %vm100_vm0, %v52_v31  ;;  %1794 = vmatmul.mubr.msk.bf16.gmra.mrb[8].mxu1 %vm100_vm0, %v52_v31 }
  0x17   :  { %495 = vmatpush1.bf16.msra.mxu0 %v2303_v32  ;;  %175 = vmatprep.mubr.bf16.mxu0 %v3006_v1 }
  0x18   :  { %536 = vmatpush1.bf16.msra.mxu1 %v2308_v33  ;;  %496 = vmatprep.subr.bf16.mxu0 %v2315_v34 }
  0x19   :  { %537 = vmatprep.subr.bf16.mxu1 %v2321_v35  ;;  %248 = vmatprep.mubr.bf16.mxu1 %v3006_v1 }
  0x1b   :  { %497 = vmatpush1.bf16.msra.mxu0 %v2328_v36 }
  0x1c   :  { %538 = vmatpush1.bf16.msra.mxu1 %v2333_v37  ;;  %498 = vmatprep.subr.bf16.mxu0 %v2348_v40 }
  0x1d   :  { %539 = vmatprep.subr.bf16.mxu1 %v2355_v41 }
  0x1e   :  { %1791 = vmatmul.mubr.msk.bf16.gmra.mrb[12].mxu0 %vm100_vm0, %v53_v42  ;;  %1795 = vmatmul.mubr.msk.bf16.gmra.mrb[12].mxu1 %vm100_vm0, %v53_v42 }
  0x1f   :  { %499 = vmatpush1.bf16.msra.mxu0 %v2361_v43  ;;  %518 = vmatprep.mubr.bf16.mxu0 %v3006_v1 }
  0x20   :  { %540 = vmatpush1.bf16.msra.mxu1 %v2368_v44  ;;  %500 = vmatprep.subr.bf16.mxu0 %v2373_v45 }
  0x21   :  { %541 = vmatprep.subr.bf16.mxu1 %v2379_v46  ;;  %559 = vmatprep.mubr.bf16.mxu1 %v3006_v1 }
  0x23   :  { %501 = vmatpush1.bf16.msra.mxu0 %v2387_v47 }
  0x24   :  { %542 = vmatpush1.bf16.msra.mxu1 %v2395_v48  ;;  %605 = vmatprep.subr.bf16.mxu0 %v2178_v8 }
  0x25   :  { %646 = vmatprep.subr.bf16.mxu1 %v2183_v9 }
  0x26   :  { %519 = vmatmul.mubr.bf16.vlgmr.msra.gmra.mrb[16].mxu0 %v2096_v49 }
  0x27   :  { %560 = vmatmul.mubr.bf16.vlgmr.msra.gmra.mrb[16].mxu1 %v2096_v49  ;;  %606 = vmatpush1.bf16.msra.mxu0 %v2188_v10 }
  0x28   :  { %647 = vmatpush1.bf16.msra.mxu1 %v2193_v11  ;;  %607 = vmatprep.subr.bf16.mxu0 %v2199_v12 }
  0x29   :  { %648 = vmatprep.subr.bf16.mxu1 %v2206_v13  ;;  %637 = vmatprep.mubr.bf16.mxu0 %v3006_v1 }
  0x2a   :  { %678 = vmatprep.mubr.bf16.mxu1 %v3006_v1 }
  0x2b   :  { %608 = vmatpush1.bf16.msra.mxu0 %v2213_v14 }
  0x2c   :  { %649 = vmatpush1.bf16.msra.mxu1 %v2218_v15  ;;  %609 = vmatprep.subr.bf16.mxu0 %v2233_v18 }
  0x2d   :  { %650 = vmatprep.subr.bf16.mxu1 %v2239_v20 }
  0x2f   :  { %610 = vmatpush1.bf16.msra.mxu0 %v2244_v21 }
  0x30   :  { %651 = vmatpush1.bf16.msra.mxu1 %v2250_v22  ;;  %611 = vmatprep.subr.bf16.mxu0 %v2257_v23 }
  0x31   :  { %652 = vmatprep.subr.bf16.mxu1 %v2263_v24 }
  0x33   :  { %612 = vmatpush1.bf16.msra.mxu0 %v2268_v25 }
  0x34   :  { %653 = vmatpush1.bf16.msra.mxu1 %v2285_v28  ;;  %613 = vmatprep.subr.bf16.mxu0 %v2290_v29 }
  0x35   :  { %654 = vmatprep.subr.bf16.mxu1 %v2297_v30 }
  0x37   :  { %614 = vmatpush1.bf16.msra.mxu0 %v2303_v32 }
  0x38   :  { %655 = vmatpush1.bf16.msra.mxu1 %v2308_v33  ;;  %615 = vmatprep.subr.bf16.mxu0 %v2315_v34 }
  0x39   :  { %656 = vmatprep.subr.bf16.mxu1 %v2321_v35 }
  0x3b   :  { %616 = vmatpush1.bf16.msra.mxu0 %v2328_v36 }
  0x3c   :  { %657 = vmatpush1.bf16.msra.mxu1 %v2333_v37  ;;  %617 = vmatprep.subr.bf16.mxu0 %v2348_v40 }
  0x3d   :  { %658 = vmatprep.subr.bf16.mxu1 %v2355_v41 }
  0x3f   :  { %618 = vmatpush1.bf16.msra.mxu0 %v2361_v43 }
  0x40   :  { %659 = vmatpush1.bf16.msra.mxu1 %v2368_v44  ;;  %619 = vmatprep.subr.bf16.mxu0 %v2373_v45 }
  0x41   :  { %660 = vmatprep.subr.bf16.mxu1 %v2379_v46 }
  0x43   :  { %620 = vmatpush1.bf16.msra.mxu0 %v2387_v47 }
  0x44   :  { %661 = vmatpush1.bf16.msra.mxu1 %v2395_v48  ;;  %724 = vmatprep.subr.bf16.mxu0 %v2178_v8 }
  0x45   :  { %765 = vmatprep.subr.bf16.mxu1 %v2183_v9 }
  0xd9   :  { %v2448_v58 = vpop.f32.mrb[0].mxu0  ;;  %v2450_v59 = vpop.f32.mrb[0].mxu1 }
  0xda   :  { %v149_v62 = vpop.f32.mrb[1].mxu0  ;;  %v222_v63 = vpop.f32.mrb[1].mxu1 }
  0xdb   :  { %v151_v2 = vpop.f32.mrb[2].mxu0  ;;  %v224_v3 = vpop.f32.mrb[2].mxu1 }
  0xdc   :  { %v2458_v4 = vadd.f32 %v151_v2, %v63_v61  ;;  %v153_v5 = vpop.f32.mrb[3].mxu0  ;;  %v2461_v6 = vadd.f32 %v224_v3, %v2446_v57  ;;  %v226_v7 = vpop.f32.mrb[3].mxu1 }
  0xdd   :  { %v2463_v16 = vadd.f32 %v153_v5, %v67_v0  ;;  %v2466_v17 = vadd.f32 %v226_v7, %v2452_v60 }
  0xe1   :  { %v157_v19 = vpop.f32.mrb[4].mxu0  ;;  %v230_v26 = vpop.f32.mrb[4].mxu1 }
  0xe2   :  { %v2468_v27 = vadd.f32 %v157_v19, %v63_v61  ;;  %v159_v31 = vpop.f32.mrb[5].mxu0  ;;  %v2471_v38 = vadd.f32 %v230_v26, %v2446_v57  ;;  %v232_v39 = vpop.f32.mrb[5].mxu1 }
  0xe3   :  { %v2473_v42 = vadd.f32 %v159_v31, %v67_v0  ;;  %v161_v49 = vpop.f32.mrb[6].mxu0  ;;  %v2476_v50 = vadd.f32 %v232_v39, %v2452_v60  ;;  %v234_v52 = vpop.f32.mrb[6].mxu1 }
  0xe4   :  { %v2478_v53 = vadd.f32 %v161_v49, %v63_v61  ;;  %v163_v55 = vpop.f32.mrb[7].mxu0  ;;  %v2481_v2 = vadd.f32 %v234_v52, %v2446_v57  ;;  %v236_v3 = vpop.f32.mrb[7].mxu1 }
  0xe5   :  { %3011 = vst [vmem:[#allocation6_spill] sm:$0xff] %v2476_v50  ;;  %v2483_v5 = vadd.f32 %v163_v55, %v67_v0  ;;  %v2486_v7 = vadd.f32 %v236_v3, %v2452_v60 }
  0xe6   :  { %3012 = vst [vmem:[#allocation7_spill] sm:$0xff] %v2478_v53  ;;  %3013 = vst [vmem:[#allocation8_spill] sm:$0xff] %v2481_v2 }
  0xe7   :  { %3014 = vst [vmem:[#allocation9_spill] sm:$0xff] %v2483_v5  ;;  %3015 = vst [vmem:[#allocation10_spill] sm:$0xff] %v2486_v7 }
  0xe9   :  { %v167_v19 = vpop.f32.mrb[8].mxu0  ;;  %v240_v26 = vpop.f32.mrb[8].mxu1 }
  0xea   :  { %v2488_v31 = vadd.f32 %v167_v19, %v63_v61  ;;  %v169_v56 = vpop.f32.mrb[9].mxu0  ;;  %v2491_v39 = vadd.f32 %v240_v26, %v2446_v57  ;;  %v242_v49 = vpop.f32.mrb[9].mxu1 }
  0xeb   :  { %v2493_v54 = vadd.f32 %v169_v56, %v67_v0  ;;  %v171_v1 = vpop.f32.mrb[10].mxu0  ;;  %v2496_v52 = vadd.f32 %v242_v49, %v2452_v60  ;;  %v244_v55 = vpop.f32.mrb[10].mxu1 }
  0xec   :  { %3016 = vst [vmem:[#allocation11_spill] sm:$0xff] %v2488_v31  ;;  %3017 = vst [vmem:[#allocation12_spill] sm:$0xff] %v2491_v39  ;;  %v2498_v51 = vadd.f32 %v171_v1, %v63_v61  ;;  %v173_v3 = vpop.f32.mrb[11].mxu0  ;;  %v2501_v7 = vadd.f32 %v244_v55, %v2446_v57  ;;  %v246_v19 = vpop.f32.mrb[11].mxu1 }
  0xed   :  { %3018 = vst [vmem:[#allocation13_spill] sm:$0xff] %v2493_v54  ;;  %3019 = vst [vmem:[#allocation14_spill] sm:$0xff] %v2496_v52  ;;  %v2503_v31 = vadd.f32 %v173_v3, %v67_v0  ;;  %v2506_v26 = vadd.f32 %v246_v19, %v2452_v60 }
  0xee   :  { %3020 = vst [vmem:[#allocation15_spill] sm:$0xff] %v2498_v51  ;;  %3021 = vst [vmem:[#allocation16_spill] sm:$0xff] %v2501_v7 }
  0xef   :  { %3022 = vst [vmem:[#allocation17_spill] sm:$0xff] %v2503_v31  ;;  %3023 = vst [vmem:[#allocation18_spill] sm:$0xff] %v2506_v26 }
  0xf1   :  { %v177_v39 = vpop.f32.mrb[12].mxu0  ;;  %v250_v56 = vpop.f32.mrb[12].mxu1 }
  0xf2   :  { %v2508_v54 = vadd.f32 %v177_v39, %v63_v61  ;;  %v179_v5 = vpop.f32.mrb[13].mxu0  ;;  %v2511_v49 = vadd.f32 %v250_v56, %v2446_v57  ;;  %v252_v1 = vpop.f32.mrb[13].mxu1 }
  0xf3   :  { %v2513_v51 = vadd.f32 %v179_v5, %v67_v0  ;;  %v181_v52 = vpop.f32.mrb[14].mxu0  ;;  %v2516_v55 = vadd.f32 %v252_v1, %v2452_v60  ;;  %v254_v3 = vpop.f32.mrb[14].mxu1  ;;  %v148_v5 = vadd.f32 %v2448_v58, %v63_v61  ;;  %v221_v1 = vadd.f32 %v2450_v59, %v2446_v57 }
  0xf4   :  { %3024 = vst [vmem:[#allocation19_spill] sm:$0xff] %v2508_v54  ;;  %3025 = vst [vmem:[#allocation20_spill] sm:$0xff] %v2511_v49  ;;  %v2518_v31 = vadd.f32 %v181_v52, %v63_v61  ;;  %v183_v19 = vpop.f32.mrb[15].mxu0  ;;  %v2521_v26 = vadd.f32 %v254_v3, %v2446_v57  ;;  %v256_v39 = vpop.f32.mrb[15].mxu1  ;;  %v223_v52 = vadd.f32 %v222_v63, %v2452_v60 }
  0xf5   :  { %3026 = vst [vmem:[#allocation21_spill] sm:$0xff] %v2513_v51  ;;  %3027 = vst [vmem:[#allocation22_spill] sm:$0xff] %v2516_v55  ;;  %v2523_v54 = vadd.f32 %v183_v19, %v67_v0  ;;  %v2526_v56 = vadd.f32 %v256_v39, %v2452_v60  ;;  %v150_v51 = vadd.f32 %v149_v62, %v67_v0 }
  0xf6   :  { %3028 = vst [vmem:[#allocation23_spill] sm:$0xff] %v2518_v31  ;;  %3029 = vst [vmem:[#allocation24_spill] sm:$0xff] %v2521_v26 }
  0xf7   :  { %3030 = vst [vmem:[#allocation25_spill] sm:$0xff] %v2523_v54  ;;  %3031 = vst [vmem:[#allocation26_spill] sm:$0xff] %v2526_v56 }
  0xf9   :  { %v520_v55 = vpop.f32.mrb[16].mxu0 }
  0xfa   :  { %v575_v31 = vadd.f32 %v520_v55, %v148_v5  ;;  %v561_v49 = vpop.f32.mrb[16].mxu1  ;;  %v522_v7 = vpop.f32.mrb[17].mxu0 }
  0xfb   :  { %v577_v3 = vadd.f32 %v561_v49, %v221_v1  ;;  %v576_v26 = vadd.f32 %v522_v7, %v150_v51  ;;  %v563_v2 = vpop.f32.mrb[17].mxu1  ;;  %v524_v19 = vpop.f32.mrb[18].mxu0 }
  0xfc   :  { %v579_v54 = vmul.f32 0.5, %v575_v31  ;;  %v578_v53 = vadd.f32 %v563_v2, %v223_v52  ;;  %v525_v39 = vpop.f32.mrb[19].mxu0  ;;  %v565_v56 = vpop.f32.mrb[18].mxu1 }
  0xfd   :  { %v583_v50 = vmul.f32 0.5, %v576_v26  ;;  %v566_v58 = vpop.f32.mrb[19].mxu1  ;;  %v3032_v56 = vmov 0  }
  0xfe   :  { %1971 = vtanh.f32 %v579_v54  ;;  %v588_v57 = vmul.f32 0.5, %v578_v53 }
  0xff   :  { %1973 = vtanh.f32 %v583_v50 }
 0x100   :  { %1975 = vtanh.f32 %v577_v3 }
 0x101   :  { %1977 = vtanh.f32 %v588_v57 }
 0x108   :  { %v1972_v59 = vpop.eup %1971 }
 0x109   :  { %v1974_v61 = vpop.eup %1973  ;;  %v581_v60 = vmul.f32 0.5, %v1972_v59 }
 0x10a   :  { %v585_v62 = vmul.f32 0.5, %v1974_v61  ;;  %v1976_v0 = vpop.eup %1975 }
 0x10b   :  { %v582_v63 = vadd.f32 0.5, %v581_v60  ;;  %v1978_v2 = vpop.eup %1977 }
 0x10c   :  { %v586_v51 = vadd.f32 0.5, %v585_v62  ;;  %v590_v26 = vmul.f32 0.5, %v1978_v2 }
 0x10d   :  { %v593_v7 = vmul.f32 %v1976_v0, %v582_v63 }
 0x10e   :  { %v592_v49 = vmul.f32 0.0, %v586_v51  ;;  %v591_v54 = vadd.f32 0.5, %v590_v26 }
 0x110   :  { %v2532_v31 = vadd.f32 %v593_v7, %v592_v49 }
 0x112   :  { %1979 = vtanh.f32 %v2532_v31 }
 0x11c   :  { %v1980_v50 = vpop.eup %1979 }
 0x11d   :  { %v596_v55 = vmul.f32 %v1980_v50, %v591_v54 }
 0x11f   :  { %v604_v53 = vpack.c.bf16 %v596_v55, %v596_v55 }
 0x121   :  { %638 = vmatmul.mubr.bf16.vlgmr.msra.gmra.mrb[20].mxu0 %v604_v53  ;;  %679 = vmatmul.mubr.bf16.vlgmr.msra.gmra.mrb[20].mxu1 %v604_v53 }
 0x122   :  { %725 = vmatpush1.bf16.msra.mxu0 %v2188_v10  ;;  %766 = vmatpush1.bf16.msra.mxu1 %v2193_v11 }
 0x123   :  { %726 = vmatprep.subr.bf16.mxu0 %v2199_v12  ;;  %767 = vmatprep.subr.bf16.mxu1 %v2206_v13 }
 0x124   :  { %756 = vmatprep.mubr.bf16.mxu0 %v3032_v56  ;;  %797 = vmatprep.mubr.bf16.mxu1 %v3032_v56 }
 0x126   :  { %727 = vmatpush1.bf16.msra.mxu0 %v2213_v14  ;;  %768 = vmatpush1.bf16.msra.mxu1 %v2218_v15 }
 0x127   :  { %728 = vmatprep.subr.bf16.mxu0 %v2233_v18  ;;  %769 = vmatprep.subr.bf16.mxu1 %v2239_v20 }
 0x12a   :  { %729 = vmatpush1.bf16.msra.mxu0 %v2244_v21  ;;  %770 = vmatpush1.bf16.msra.mxu1 %v2250_v22 }
 0x12b   :  { %730 = vmatprep.subr.bf16.mxu0 %v2257_v23  ;;  %771 = vmatprep.subr.bf16.mxu1 %v2263_v24 }
 0x12e   :  { %731 = vmatpush1.bf16.msra.mxu0 %v2268_v25  ;;  %772 = vmatpush1.bf16.msra.mxu1 %v2285_v28 }
 0x12f   :  { %732 = vmatprep.subr.bf16.mxu0 %v2290_v29  ;;  %773 = vmatprep.subr.bf16.mxu1 %v2297_v30 }
 0x132   :  { %733 = vmatpush1.bf16.msra.mxu0 %v2303_v32  ;;  %774 = vmatpush1.bf16.msra.mxu1 %v2308_v33 }
 0x133   :  { %734 = vmatprep.subr.bf16.mxu0 %v2315_v34  ;;  %775 = vmatprep.subr.bf16.mxu1 %v2321_v35 }
 0x136   :  { %735 = vmatpush1.bf16.msra.mxu0 %v2328_v36  ;;  %776 = vmatpush1.bf16.msra.mxu1 %v2333_v37 }
 0x137   :  { %736 = vmatprep.subr.bf16.mxu0 %v2348_v40  ;;  %777 = vmatprep.subr.bf16.mxu1 %v2355_v41 }
 0x13a   :  { %737 = vmatpush1.bf16.msra.mxu0 %v2361_v43  ;;  %778 = vmatpush1.bf16.msra.mxu1 %v2368_v44 }
 0x13b   :  { %738 = vmatprep.subr.bf16.mxu0 %v2373_v45  ;;  %779 = vmatprep.subr.bf16.mxu1 %v2379_v46 }
 0x13e   :  { %739 = vmatpush1.bf16.msra.mxu0 %v2387_v47  ;;  %780 = vmatpush1.bf16.msra.mxu1 %v2395_v48 }
 0x13f   :  { %843 = vmatprep.subr.bf16.mxu0 %v2178_v8  ;;  %884 = vmatprep.subr.bf16.mxu1 %v2183_v9 }
 0x1f4   :  { %v639_v5 = vpop.f32.mrb[20].mxu0  ;;  %v680_v1 = vpop.f32.mrb[20].mxu1 }
 0x1f5   :  { %v694_v52 = vadd.f32 %v639_v5, %v2458_v4  ;;  %v696_v3 = vadd.f32 %v680_v1, %v2461_v6  ;;  %v641_v19 = vpop.f32.mrb[21].mxu0  ;;  %v682_v39 = vpop.f32.mrb[21].mxu1 }
 0x1f6   :  { %v695_v58 = vadd.f32 %v641_v19, %v2463_v16  ;;  %v697_v57 = vadd.f32 %v682_v39, %v2466_v17  ;;  %v643_v59 = vpop.f32.mrb[22].mxu0  ;;  %v684_v61 = vpop.f32.mrb[22].mxu1 }
 0x1f7   :  { %v698_v60 = vmul.f32 0.5, %v694_v52  ;;  %v644_v62 = vpop.f32.mrb[23].mxu0  ;;  %v685_v63 = vpop.f32.mrb[23].mxu1 }
 0x1f8   :  { %v702_v0 = vmul.f32 0.5, %v695_v58  ;;  %v707_v51 = vmul.f32 0.5, %v697_v57 }
 0x1f9   :  { %1981 = vtanh.f32 %v698_v60  ;;  %v3033_v60 = vld [vmem:[#allocation6_spill] sm:$0xff] }
 0x1fa   :  { %1983 = vtanh.f32 %v702_v0 }
 0x1fb   :  { %1985 = vtanh.f32 %v696_v3 }
 0x1fc   :  { %1987 = vtanh.f32 %v707_v51 }
 0x203   :  { %v1982_v7 = vpop.eup %1981 }
 0x204   :  { %v1984_v4 = vpop.eup %1983  ;;  %v700_v49 = vmul.f32 0.5, %v1982_v7 }
 0x205   :  { %v704_v6 = vmul.f32 0.5, %v1984_v4  ;;  %v1986_v26 = vpop.eup %1985 }
 0x206   :  { %v701_v2 = vadd.f32 0.5, %v700_v49  ;;  %v1988_v55 = vpop.eup %1987 }
 0x207   :  { %v705_v16 = vadd.f32 0.5, %v704_v6  ;;  %v709_v53 = vmul.f32 0.5, %v1988_v55 }
 0x208   :  { %v712_v54 = vmul.f32 %v1986_v26, %v701_v2 }
 0x209   :  { %v711_v17 = vmul.f32 %v705_v16, %v2532_v31  ;;  %v710_v5 = vadd.f32 0.5, %v709_v53 }
 0x20b   :  { %v2574_v50 = vadd.f32 %v712_v54, %v711_v17 }
 0x20d   :  { %1989 = vtanh.f32 %v2574_v50 }
 0x217   :  { %v1990_v1 = vpop.eup %1989 }
 0x218   :  { %v715_v52 = vmul.f32 %v1990_v1, %v710_v5 }
 0x21a   :  { %v723_v3 = vpack.c.bf16 %v715_v52, %v715_v52 }
 0x21c   :  { %757 = vmatmul.mubr.bf16.vlgmr.msra.gmra.mrb[24].mxu0 %v723_v3  ;;  %798 = vmatmul.mubr.bf16.vlgmr.msra.gmra.mrb[24].mxu1 %v723_v3 }
 0x21d   :  { %844 = vmatpush1.bf16.msra.mxu0 %v2188_v10  ;;  %885 = vmatpush1.bf16.msra.mxu1 %v2193_v11 }
 0x21e   :  { %845 = vmatprep.subr.bf16.mxu0 %v2199_v12  ;;  %886 = vmatprep.subr.bf16.mxu1 %v2206_v13 }
 0x21f   :  { %875 = vmatprep.mubr.bf16.mxu0 %v3032_v56  ;;  %916 = vmatprep.mubr.bf16.mxu1 %v3032_v56 }
 0x221   :  { %846 = vmatpush1.bf16.msra.mxu0 %v2213_v14  ;;  %887 = vmatpush1.bf16.msra.mxu1 %v2218_v15 }
 0x222   :  { %847 = vmatprep.subr.bf16.mxu0 %v2233_v18  ;;  %888 = vmatprep.subr.bf16.mxu1 %v2239_v20 }
 0x225   :  { %848 = vmatpush1.bf16.msra.mxu0 %v2244_v21  ;;  %889 = vmatpush1.bf16.msra.mxu1 %v2250_v22 }
 0x226   :  { %849 = vmatprep.subr.bf16.mxu0 %v2257_v23  ;;  %890 = vmatprep.subr.bf16.mxu1 %v2263_v24 }
 0x229   :  { %850 = vmatpush1.bf16.msra.mxu0 %v2268_v25  ;;  %891 = vmatpush1.bf16.msra.mxu1 %v2285_v28 }
 0x22a   :  { %851 = vmatprep.subr.bf16.mxu0 %v2290_v29  ;;  %892 = vmatprep.subr.bf16.mxu1 %v2297_v30 }
 0x22d   :  { %852 = vmatpush1.bf16.msra.mxu0 %v2303_v32  ;;  %893 = vmatpush1.bf16.msra.mxu1 %v2308_v33 }
 0x22e   :  { %853 = vmatprep.subr.bf16.mxu0 %v2315_v34  ;;  %894 = vmatprep.subr.bf16.mxu1 %v2321_v35 }
 0x231   :  { %854 = vmatpush1.bf16.msra.mxu0 %v2328_v36  ;;  %895 = vmatpush1.bf16.msra.mxu1 %v2333_v37 }
 0x232   :  { %855 = vmatprep.subr.bf16.mxu0 %v2348_v40  ;;  %896 = vmatprep.subr.bf16.mxu1 %v2355_v41 }
 0x235   :  { %856 = vmatpush1.bf16.msra.mxu0 %v2361_v43  ;;  %897 = vmatpush1.bf16.msra.mxu1 %v2368_v44 }
 0x236   :  { %857 = vmatprep.subr.bf16.mxu0 %v2373_v45  ;;  %898 = vmatprep.subr.bf16.mxu1 %v2379_v46 }
 0x239   :  { %858 = vmatpush1.bf16.msra.mxu0 %v2387_v47  ;;  %899 = vmatpush1.bf16.msra.mxu1 %v2395_v48 }
 0x23a   :  { %962 = vmatprep.subr.bf16.mxu0 %v2178_v8  ;;  %1003 = vmatprep.subr.bf16.mxu1 %v2183_v9 }
 0x2ef   :  { %v758_v31 = vpop.f32.mrb[24].mxu0  ;;  %v799_v19 = vpop.f32.mrb[24].mxu1 }
 0x2f0   :  { %v813_v39 = vadd.f32 %v758_v31, %v2468_v27  ;;  %v815_v58 = vadd.f32 %v799_v19, %v2471_v38  ;;  %v760_v57 = vpop.f32.mrb[25].mxu0  ;;  %v801_v59 = vpop.f32.mrb[25].mxu1 }
 0x2f1   :  { %v814_v61 = vadd.f32 %v760_v57, %v2473_v42  ;;  %v816_v62 = vadd.f32 %v801_v59, %v3033_v60  ;;  %v762_v63 = vpop.f32.mrb[26].mxu0  ;;  %v803_v0 = vpop.f32.mrb[26].mxu1  ;;  %v3035_v59 = vld [vmem:[#allocation8_spill] sm:$0xff] }
 0x2f2   :  { %v817_v51 = vmul.f32 0.5, %v813_v39  ;;  %v763_v7 = vpop.f32.mrb[27].mxu0  ;;  %v804_v4 = vpop.f32.mrb[27].mxu1  ;;  %v3036_v63 = vld [vmem:[#allocation9_spill] sm:$0xff] }
 0x2f3   :  { %v821_v49 = vmul.f32 0.5, %v814_v61  ;;  %v826_v6 = vmul.f32 0.5, %v816_v62 }
 0x2f4   :  { %1991 = vtanh.f32 %v817_v51  ;;  %v3037_v51 = vld [vmem:[#allocation10_spill] sm:$0xff] }
 0x2f5   :  { %1993 = vtanh.f32 %v821_v49 }
 0x2f6   :  { %1995 = vtanh.f32 %v815_v58  ;;  %v3034_v58 = vld [vmem:[#allocation7_spill] sm:$0xff] }
 0x2f7   :  { %1997 = vtanh.f32 %v826_v6 }
 0x2fe   :  { %v1992_v2 = vpop.eup %1991 }
 0x2ff   :  { %v1994_v27 = vpop.eup %1993  ;;  %v819_v26 = vmul.f32 0.5, %v1992_v2 }
 0x300   :  { %v823_v38 = vmul.f32 0.5, %v1994_v27  ;;  %v1996_v54 = vpop.eup %1995 }
 0x301   :  { %v820_v16 = vadd.f32 0.5, %v819_v26  ;;  %v1998_v5 = vpop.eup %1997 }
 0x302   :  { %v824_v42 = vadd.f32 0.5, %v823_v38  ;;  %v828_v1 = vmul.f32 0.5, %v1998_v5 }
 0x303   :  { %v831_v17 = vmul.f32 %v1996_v54, %v820_v16 }
 0x304   :  { %v830_v55 = vmul.f32 %v824_v42, %v2574_v50  ;;  %v829_v52 = vadd.f32 0.5, %v828_v1 }
 0x306   :  { %v2616_v53 = vadd.f32 %v831_v17, %v830_v55 }
 0x308   :  { %1999 = vtanh.f32 %v2616_v53 }
 0x312   :  { %v2000_v3 = vpop.eup %1999 }
 0x313   :  { %v834_v31 = vmul.f32 %v2000_v3, %v829_v52 }
 0x315   :  { %v842_v19 = vpack.c.bf16 %v834_v31, %v834_v31 }
 0x317   :  { %876 = vmatmul.mubr.bf16.vlgmr.msra.gmra.mrb[28].mxu0 %v842_v19  ;;  %917 = vmatmul.mubr.bf16.vlgmr.msra.gmra.mrb[28].mxu1 %v842_v19 }
 0x318   :  { %963 = vmatpush1.bf16.msra.mxu0 %v2188_v10  ;;  %1004 = vmatpush1.bf16.msra.mxu1 %v2193_v11 }
 0x319   :  { %964 = vmatprep.subr.bf16.mxu0 %v2199_v12  ;;  %1005 = vmatprep.subr.bf16.mxu1 %v2206_v13 }
 0x31a   :  { %994 = vmatprep.mubr.bf16.mxu0 %v3032_v56  ;;  %1035 = vmatprep.mubr.bf16.mxu1 %v3032_v56 }
 0x31c   :  { %965 = vmatpush1.bf16.msra.mxu0 %v2213_v14  ;;  %1006 = vmatpush1.bf16.msra.mxu1 %v2218_v15 }
 0x31d   :  { %966 = vmatprep.subr.bf16.mxu0 %v2233_v18  ;;  %1007 = vmatprep.subr.bf16.mxu1 %v2239_v20 }
 0x320   :  { %967 = vmatpush1.bf16.msra.mxu0 %v2244_v21  ;;  %1008 = vmatpush1.bf16.msra.mxu1 %v2250_v22 }
 0x321   :  { %968 = vmatprep.subr.bf16.mxu0 %v2257_v23  ;;  %1009 = vmatprep.subr.bf16.mxu1 %v2263_v24 }
 0x324   :  { %969 = vmatpush1.bf16.msra.mxu0 %v2268_v25  ;;  %1010 = vmatpush1.bf16.msra.mxu1 %v2285_v28 }
 0x325   :  { %970 = vmatprep.subr.bf16.mxu0 %v2290_v29  ;;  %1011 = vmatprep.subr.bf16.mxu1 %v2297_v30 }
 0x328   :  { %971 = vmatpush1.bf16.msra.mxu0 %v2303_v32  ;;  %1012 = vmatpush1.bf16.msra.mxu1 %v2308_v33 }
 0x329   :  { %972 = vmatprep.subr.bf16.mxu0 %v2315_v34  ;;  %1013 = vmatprep.subr.bf16.mxu1 %v2321_v35 }
 0x32c   :  { %973 = vmatpush1.bf16.msra.mxu0 %v2328_v36  ;;  %1014 = vmatpush1.bf16.msra.mxu1 %v2333_v37 }
 0x32d   :  { %974 = vmatprep.subr.bf16.mxu0 %v2348_v40  ;;  %1015 = vmatprep.subr.bf16.mxu1 %v2355_v41 }
 0x330   :  { %975 = vmatpush1.bf16.msra.mxu0 %v2361_v43  ;;  %1016 = vmatpush1.bf16.msra.mxu1 %v2368_v44 }
 0x331   :  { %976 = vmatprep.subr.bf16.mxu0 %v2373_v45  ;;  %1017 = vmatprep.subr.bf16.mxu1 %v2379_v46 }
 0x334   :  { %977 = vmatpush1.bf16.msra.mxu0 %v2387_v47  ;;  %1018 = vmatpush1.bf16.msra.mxu1 %v2395_v48 }
 0x335   :  { %1081 = vmatprep.subr.bf16.mxu0 %v2178_v8  ;;  %1122 = vmatprep.subr.bf16.mxu1 %v2183_v9 }
 0x3ea   :  { %v877_v50 = vpop.f32.mrb[28].mxu0  ;;  %v918_v39 = vpop.f32.mrb[28].mxu1 }
 0x3eb   :  { %v932_v57 = vadd.f32 %v877_v50, %v3034_v58  ;;  %v934_v61 = vadd.f32 %v918_v39, %v3035_v59  ;;  %v879_v60 = vpop.f32.mrb[29].mxu0  ;;  %v920_v62 = vpop.f32.mrb[29].mxu1 }
 0x3ec   :  { %v933_v0 = vadd.f32 %v879_v60, %v3036_v63  ;;  %v935_v7 = vadd.f32 %v920_v62, %v3037_v51  ;;  %v881_v4 = vpop.f32.mrb[30].mxu0  ;;  %v922_v49 = vpop.f32.mrb[30].mxu1 }
 0x3ed   :  { %v936_v6 = vmul.f32 0.5, %v932_v57  ;;  %v882_v2 = vpop.f32.mrb[31].mxu0  ;;  %v923_v27 = vpop.f32.mrb[31].mxu1 }
 0x3ee   :  { %v940_v8 = vmul.f32 0.5, %v933_v0  ;;  %v945_v9 = vmul.f32 0.5, %v935_v7 }
 0x3ef   :  { %2001 = vtanh.f32 %v936_v6 }
 0x3f0   :  { %2003 = vtanh.f32 %v940_v8 }
 0x3f1   :  { %2005 = vtanh.f32 %v934_v61 }
 0x3f2   :  { %2007 = vtanh.f32 %v945_v9 }
 0x3f9   :  { %v2002_v26 = vpop.eup %2001 }
 0x3fa   :  { %v2004_v38 = vpop.eup %2003  ;;  %v938_v16 = vmul.f32 0.5, %v2002_v26 }
 0x3fb   :  { %v942_v54 = vmul.f32 0.5, %v2004_v38  ;;  %v2006_v17 = vpop.eup %2005 }
 0x3fc   :  { %v939_v42 = vadd.f32 0.5, %v938_v16  ;;  %v2008_v3 = vpop.eup %2007 }
 0x3fd   :  { %v943_v55 = vadd.f32 0.5, %v942_v54  ;;  %v947_v31 = vmul.f32 0.5, %v2008_v3  ;;  %v2754_v3 = vld [vmem:[%s2995_s2 + $0x44] ss:$16 sps:$4 sm:$0xff]  }
 0x3fe   :  { %v950_v5 = vmul.f32 %v2006_v17, %v939_v42  ;;  %v2716_v42 = vld [vmem:[%s2995_s2] ss:$16 sps:$4 sm:$0xff]   ;;  %v2722_v17 = vld [vmem:[%s2995_s2 + $0x8] ss:$16 sps:$4 sm:$0xff]  }
 0x3ff   :  { %v949_v1 = vmul.f32 %v943_v55, %v2616_v53  ;;  %v948_v19 = vadd.f32 0.5, %v947_v31  ;;  %v2728_v55 = vld [vmem:[%s2995_s2 + $0x24] ss:$16 sps:$4 sm:$0xff]   ;;  %v2760_v31 = vld [vmem:[%s2995_s2 + $0x4c] ss:$16 sps:$4 sm:$0xff]  }
 0x401   :  { %v2658_v52 = vadd.f32 %v950_v5, %v949_v1  ;;  %v2734_v5 = vld [vmem:[%s2995_s2 + $0x2c] ss:$16 sps:$4 sm:$0xff]   ;;  %v2742_v1 = vld [vmem:[%s2995_s2 + $0x20] ss:$16 sps:$4 sm:$0xff]  }
 0x403   :  { %2009 = vtanh.f32 %v2658_v52 }
 0x40d   :  { %v2010_v50 = vpop.eup %2009 }
 0x40e   :  { %v953_v39 = vmul.f32 %v2010_v50, %v948_v19  ;;  %v2766_v19 = vld [vmem:[%s2995_s2 + $0x40] ss:$16 sps:$4 sm:$0xff]   ;;  %v2772_v50 = vld [vmem:[%s2995_s2 + $0x48] ss:$16 sps:$4 sm:$0xff]  }
 0x410   :  { %v961_v58 = vpack.c.bf16 %v953_v39, %v953_v39  ;;  %v2778_v39 = vld [vmem:[%s2995_s2 + $0x64] ss:$16 sps:$4 sm:$0xff]  }
 0x412   :  { %995 = vmatmul.mubr.bf16.vlgmr.msra.gmra.mrb[32].mxu0 %v961_v58  ;;  %1036 = vmatmul.mubr.bf16.vlgmr.msra.gmra.mrb[32].mxu1 %v961_v58  ;;  %v2784_v58 = vld [vmem:[%s2995_s2 + $0x6c] ss:$16 sps:$4 sm:$0xff]  }
 0x413   :  { %1082 = vmatpush1.bf16.msra.mxu0 %v2188_v10  ;;  %1123 = vmatpush1.bf16.msra.mxu1 %v2193_v11  ;;  %v2696_v10 = vld [vmem:[%s2995_s2 + $0x4] ss:$16 sps:$4 sm:$0xff]   ;;  %v2702_v11 = vld [vmem:[%s2995_s2 + $0xc] ss:$16 sps:$4 sm:$0xff]  }
 0x414   :  { %1083 = vmatprep.subr.bf16.mxu0 %v2199_v12  ;;  %1124 = vmatprep.subr.bf16.mxu1 %v2206_v13 }
 0x415   :  { %1113 = vmatprep.mubr.bf16.mxu0 %v3032_v56  ;;  %1154 = vmatprep.mubr.bf16.mxu1 %v3032_v56 }
 0x417   :  { %1084 = vmatpush1.bf16.msra.mxu0 %v2213_v14  ;;  %1125 = vmatpush1.bf16.msra.mxu1 %v2218_v15  ;;  %v3038_v14 = vld [vmem:[#allocation11_spill] sm:$0xff] }
 0x418   :  { %1085 = vmatprep.subr.bf16.mxu0 %v2233_v18  ;;  %1126 = vmatprep.subr.bf16.mxu1 %v2239_v20  ;;  %v3039_v18 = vld [vmem:[#allocation12_spill] sm:$0xff] }
 0x41b   :  { %1086 = vmatpush1.bf16.msra.mxu0 %v2244_v21  ;;  %1127 = vmatpush1.bf16.msra.mxu1 %v2250_v22 }
 0x41c   :  { %1087 = vmatprep.subr.bf16.mxu0 %v2257_v23  ;;  %1128 = vmatprep.subr.bf16.mxu1 %v2263_v24  ;;  %v3040_v23 = vld [vmem:[#allocation13_spill] sm:$0xff] }
 0x41f   :  { %1088 = vmatpush1.bf16.msra.mxu0 %v2268_v25  ;;  %1129 = vmatpush1.bf16.msra.mxu1 %v2285_v28  ;;  %v3041_v25 = vld [vmem:[#allocation14_spill] sm:$0xff] }
 0x420   :  { %1089 = vmatprep.subr.bf16.mxu0 %v2290_v29  ;;  %1130 = vmatprep.subr.bf16.mxu1 %v2297_v30 }
 0x423   :  { %1090 = vmatpush1.bf16.msra.mxu0 %v2303_v32  ;;  %1131 = vmatpush1.bf16.msra.mxu1 %v2308_v33 }
 0x424   :  { %1091 = vmatprep.subr.bf16.mxu0 %v2315_v34  ;;  %1132 = vmatprep.subr.bf16.mxu1 %v2321_v35 }
 0x427   :  { %1092 = vmatpush1.bf16.msra.mxu0 %v2328_v36  ;;  %1133 = vmatpush1.bf16.msra.mxu1 %v2333_v37 }
 0x428   :  { %1093 = vmatprep.subr.bf16.mxu0 %v2348_v40  ;;  %1134 = vmatprep.subr.bf16.mxu1 %v2355_v41 }
 0x42b   :  { %1094 = vmatpush1.bf16.msra.mxu0 %v2361_v43  ;;  %1135 = vmatpush1.bf16.msra.mxu1 %v2368_v44 }
 0x42c   :  { %1095 = vmatprep.subr.bf16.mxu0 %v2373_v45  ;;  %1136 = vmatprep.subr.bf16.mxu1 %v2379_v46 }
 0x42f   :  { %1096 = vmatpush1.bf16.msra.mxu0 %v2387_v47  ;;  %1137 = vmatpush1.bf16.msra.mxu1 %v2395_v48 }
 0x430   :  { %1200 = vmatprep.subr.bf16.mxu0 %v2696_v10  ;;  %1241 = vmatprep.subr.bf16.mxu1 %v2702_v11 }
 0x4e5   :  { %v996_v12 = vpop.f32.mrb[32].mxu0  ;;  %v1037_v13 = vpop.f32.mrb[32].mxu1 }
 0x4e6   :  { %v1051_v15 = vadd.f32 %v996_v12, %v3038_v14  ;;  %v1053_v20 = vadd.f32 %v1037_v13, %v3039_v18  ;;  %v998_v21 = vpop.f32.mrb[33].mxu0  ;;  %v1039_v22 = vpop.f32.mrb[33].mxu1  ;;  %v2790_v12 = vld [vmem:[%s2995_s2 + $0x60] ss:$16 sps:$4 sm:$0xff]   ;;  %v2796_v13 = vld [vmem:[%s2995_s2 + $0x68] ss:$16 sps:$4 sm:$0xff]  }
 0x4e7   :  { %v1052_v24 = vadd.f32 %v998_v21, %v3040_v23  ;;  %v1054_v28 = vadd.f32 %v1039_v22, %v3041_v25  ;;  %v1000_v29 = vpop.f32.mrb[34].mxu0  ;;  %v1041_v30 = vpop.f32.mrb[34].mxu1  ;;  %v2802_v14 = vld [vmem:[%s2995_s2 + $0x84] ss:$16 sps:$4 sm:$0xff]  }
 0x4e8   :  { %v1055_v53 = vmul.f32 0.5, %v1051_v15  ;;  %v1001_v57 = vpop.f32.mrb[35].mxu0  ;;  %v1042_v59 = vpop.f32.mrb[35].mxu1  ;;  %v2808_v15 = vld [vmem:[%s2995_s2 + $0x8c] ss:$16 sps:$4 sm:$0xff]  }
 0x4e9   :  { %v1059_v61 = vmul.f32 0.5, %v1052_v24  ;;  %v1064_v60 = vmul.f32 0.5, %v1054_v28 }
 0x4ea   :  { %2011 = vtanh.f32 %v1055_v53 }
 0x4eb   :  { %2013 = vtanh.f32 %v1059_v61 }
 0x4ec   :  { %2015 = vtanh.f32 %v1053_v20 }
 0x4ed   :  { %2017 = vtanh.f32 %v1064_v60 }
 0x4f4   :  { %v2012_v62 = vpop.eup %2011 }
 0x4f5   :  { %v2014_v63 = vpop.eup %2013  ;;  %v1057_v0 = vmul.f32 0.5, %v2012_v62 }
 0x4f6   :  { %v1061_v51 = vmul.f32 0.5, %v2014_v63  ;;  %v2016_v4 = vpop.eup %2015 }
 0x4f7   :  { %v1058_v7 = vadd.f32 0.5, %v1057_v0  ;;  %v2018_v8 = vpop.eup %2017 }
 0x4f8   :  { %v1062_v49 = vadd.f32 0.5, %v1061_v51  ;;  %v1066_v9 = vmul.f32 0.5, %v2018_v8  ;;  %v2087_v8 = vld [vmem:[%s2995_s2 + $0xc4] ss:$16 sps:$4 sm:$0xff]  }
 0x4f9   :  { %v1069_v6 = vmul.f32 %v2016_v4, %v1058_v7  ;;  %v2081_v7 = vld [vmem:[%s2995_s2 + $0x80] ss:$16 sps:$4 sm:$0xff]   ;;  %v2082_v4 = vld [vmem:[%s2995_s2 + $0x88] ss:$16 sps:$4 sm:$0xff]  }
 0x4fa   :  { %v1068_v2 = vmul.f32 %v1062_v49, %v2658_v52  ;;  %v1067_v26 = vadd.f32 0.5, %v1066_v9  ;;  %v2748_v52 = vld [vmem:[%s2995_s2 + $0x28] ss:$16 sps:$4 sm:$0xff]   ;;  %v2083_v49 = vld [vmem:[%s2995_s2 + $0xa4] ss:$16 sps:$4 sm:$0xff]  }
 0x4fb   :  { %v2088_v9 = vld [vmem:[%s2995_s2 + $0xcc] ss:$16 sps:$4 sm:$0xff]  }
 0x4fc   :  { %v2710_v27 = vadd.f32 %v1069_v6, %v1068_v2  ;;  %v2084_v6 = vld [vmem:[%s2995_s2 + $0xac] ss:$16 sps:$4 sm:$0xff]   ;;  %v2085_v2 = vld [vmem:[%s2995_s2 + $0xa0] ss:$16 sps:$4 sm:$0xff]  }
 0x4fe   :  { %2019 = vtanh.f32 %v2710_v27 }
 0x508   :  { %v2020_v38 = vpop.eup %2019 }
 0x509   :  { %v1072_v16 = vmul.f32 %v2020_v38, %v1067_v26  ;;  %v2089_v26 = vld [vmem:[%s2995_s2 + $0xc0] ss:$16 sps:$4 sm:$0xff]   ;;  %v2090_v38 = vld [vmem:[%s2995_s2 + $0xc8] ss:$16 sps:$4 sm:$0xff]  }
 0x50b   :  { %v1080_v54 = vpack.c.bf16 %v1072_v16, %v1072_v16  ;;  %v2091_v16 = vld [vmem:[%s2995_s2 + $0xe4] ss:$16 sps:$4 sm:$0xff]  }
 0x50d   :  { %1114 = vmatmul.mubr.bf16.vlgmr.msra.gmra.mrb[36].mxu0 %v1080_v54  ;;  %1155 = vmatmul.mubr.bf16.vlgmr.msra.gmra.mrb[36].mxu1 %v1080_v54  ;;  %v2092_v54 = vld [vmem:[%s2995_s2 + $0xec] ss:$16 sps:$4 sm:$0xff]  }
 0x50e   :  { %1201 = vmatpush1.bf16.msra.mxu0 %v2716_v42  ;;  %1242 = vmatpush1.bf16.msra.mxu1 %v2722_v17 }
 0x50f   :  { %1202 = vmatprep.subr.bf16.mxu0 %v2728_v55  ;;  %1243 = vmatprep.subr.bf16.mxu1 %v2734_v5 }
 0x510   :  { %1232 = vmatprep.mubr.bf16.mxu0 %v3032_v56  ;;  %1273 = vmatprep.mubr.bf16.mxu1 %v3032_v56 }
 0x512   :  { %1203 = vmatpush1.bf16.msra.mxu0 %v2742_v1  ;;  %1244 = vmatpush1.bf16.msra.mxu1 %v2748_v52 }
 0x513   :  { %1204 = vmatprep.subr.bf16.mxu0 %v2754_v3  ;;  %1245 = vmatprep.subr.bf16.mxu1 %v2760_v31 }
 0x516   :  { %1205 = vmatpush1.bf16.msra.mxu0 %v2766_v19  ;;  %1246 = vmatpush1.bf16.msra.mxu1 %v2772_v50 }
 0x517   :  { %1206 = vmatprep.subr.bf16.mxu0 %v2778_v39  ;;  %1247 = vmatprep.subr.bf16.mxu1 %v2784_v58 }
 0x51a   :  { %1207 = vmatpush1.bf16.msra.mxu0 %v2790_v12  ;;  %1248 = vmatpush1.bf16.msra.mxu1 %v2796_v13 }
 0x51b   :  { %1208 = vmatprep.subr.bf16.mxu0 %v2802_v14  ;;  %1249 = vmatprep.subr.bf16.mxu1 %v2808_v15 }
 0x51e   :  { %1209 = vmatpush1.bf16.msra.mxu0 %v2303_v32  ;;  %1250 = vmatpush1.bf16.msra.mxu1 %v2308_v33 }
 0x51f   :  { %1210 = vmatprep.subr.bf16.mxu0 %v2315_v34  ;;  %1251 = vmatprep.subr.bf16.mxu1 %v2321_v35  ;;  %v3042_v34 = vld [vmem:[#allocation15_spill] sm:$0xff] }
 0x522   :  { %1211 = vmatpush1.bf16.msra.mxu0 %v2328_v36  ;;  %1252 = vmatpush1.bf16.msra.mxu1 %v2333_v37  ;;  %v3043_v36 = vld [vmem:[#allocation16_spill] sm:$0xff] }
 0x523   :  { %1212 = vmatprep.subr.bf16.mxu0 %v2348_v40  ;;  %1253 = vmatprep.subr.bf16.mxu1 %v2355_v41 }
 0x526   :  { %1213 = vmatpush1.bf16.msra.mxu0 %v2361_v43  ;;  %1254 = vmatpush1.bf16.msra.mxu1 %v2368_v44  ;;  %v3044_v43 = vld [vmem:[#allocation17_spill] sm:$0xff] }
 0x527   :  { %1214 = vmatprep.subr.bf16.mxu0 %v2373_v45  ;;  %1255 = vmatprep.subr.bf16.mxu1 %v2379_v46  ;;  %v3045_v45 = vld [vmem:[#allocation18_spill] sm:$0xff] }
 0x52a   :  { %1215 = vmatpush1.bf16.msra.mxu0 %v2387_v47  ;;  %1256 = vmatpush1.bf16.msra.mxu1 %v2395_v48 }
 0x52b   :  { %1319 = vmatprep.subr.bf16.mxu0 %v2696_v10  ;;  %1360 = vmatprep.subr.bf16.mxu1 %v2702_v11 }
 0x5e0   :  { %v1115_v32 = vpop.f32.mrb[36].mxu0  ;;  %v1156_v33 = vpop.f32.mrb[36].mxu1 }
 0x5e1   :  { %v1170_v35 = vadd.f32 %v1115_v32, %v3042_v34  ;;  %v1172_v37 = vadd.f32 %v1156_v33, %v3043_v36  ;;  %v1117_v40 = vpop.f32.mrb[37].mxu0  ;;  %v1158_v41 = vpop.f32.mrb[37].mxu1 }
 0x5e2   :  { %v1171_v44 = vadd.f32 %v1117_v40, %v3044_v43  ;;  %v1173_v46 = vadd.f32 %v1158_v41, %v3045_v45  ;;  %v1119_v18 = vpop.f32.mrb[38].mxu0  ;;  %v1160_v47 = vpop.f32.mrb[38].mxu1 }
 0x5e3   :  { %v1174_v20 = vmul.f32 0.5, %v1170_v35  ;;  %v1120_v48 = vpop.f32.mrb[39].mxu0  ;;  %v1161_v21 = vpop.f32.mrb[39].mxu1 }
 0x5e4   :  { %v1178_v10 = vmul.f32 0.5, %v1171_v44  ;;  %v1183_v11 = vmul.f32 0.5, %v1173_v46 }
 0x5e5   :  { %2021 = vtanh.f32 %v1174_v20 }
 0x5e6   :  { %2023 = vtanh.f32 %v1178_v10 }
 0x5e7   :  { %2025 = vtanh.f32 %v1172_v37 }
 0x5e8   :  { %2027 = vtanh.f32 %v1183_v11 }
 0x5ef   :  { %v2022_v22 = vpop.eup %2021 }
 0x5f0   :  { %v2024_v23 = vpop.eup %2023  ;;  %v1176_v24 = vmul.f32 0.5, %v2022_v22 }
 0x5f1   :  { %v1180_v25 = vmul.f32 0.5, %v2024_v23  ;;  %v2026_v29 = vpop.eup %2025 }
 0x5f2   :  { %v1177_v28 = vadd.f32 0.5, %v1176_v24  ;;  %v2028_v61 = vpop.eup %2027  ;;  %v1943_v24 = vld [vmem:[%s2997_s4 + $0x4] ss:$8 sps:$4 sm:$0xff]  }
 0x5f3   :  { %v1181_v30 = vadd.f32 0.5, %v1180_v25  ;;  %v1185_v60 = vmul.f32 0.5, %v2028_v61  ;;  %v1941_v25 = vld [vmem:[%s2997_s4] ss:$8 sps:$4 sm:$0xff]  }
 0x5f4   :  { %v1188_v53 = vmul.f32 %v2026_v29, %v1177_v28  ;;  %v1946_v28 = vld [vmem:[%s2997_s4 + $0x14] ss:$8 sps:$4 sm:$0xff]   ;;  %v1944_v29 = vld [vmem:[%s2997_s4 + $0x10] ss:$8 sps:$4 sm:$0xff]   ;;  %v1953_v61 = vld [vmem:[%s2997_s4 + $0x40] ss:$8 sps:$4 sm:$0xff]  }
 0x5f5   :  { %v1187_v57 = vmul.f32 %v1181_v30, %v2710_v27  ;;  %v1186_v62 = vadd.f32 0.5, %v1185_v60  ;;  %v2086_v27 = vld [vmem:[%s2995_s2 + $0xa8] ss:$16 sps:$4 sm:$0xff]   ;;  %v1958_v60 = vld [vmem:[%s2997_s4 + $0x54] ss:$8 sps:$4 sm:$0xff]  }
 0x5f6   :  { %v1947_v30 = vld [vmem:[%s2997_s4 + $0x20] ss:$8 sps:$4 sm:$0xff]  }
 0x5f7   :  { %v2832_v59 = vadd.f32 %v1188_v53, %v1187_v57  ;;  %v1952_v53 = vld [vmem:[%s2997_s4 + $0x34] ss:$8 sps:$4 sm:$0xff]   ;;  %v1950_v57 = vld [vmem:[%s2997_s4 + $0x30] ss:$8 sps:$4 sm:$0xff]  }
 0x5f9   :  { %2029 = vtanh.f32 %v2832_v59 }
 0x603   :  { %v2030_v63 = vpop.eup %2029 }
 0x604   :  { %v1191_v0 = vmul.f32 %v2030_v63, %v1186_v62  ;;  %v1956_v62 = vld [vmem:[%s2997_s4 + $0x50] ss:$8 sps:$4 sm:$0xff]   ;;  %v1961_v63 = vld [vmem:[%s2997_s4 + $0x64] ss:$8 sps:$4 sm:$0xff]  }
 0x606   :  { %v1199_v51 = vpack.c.bf16 %v1191_v0, %v1191_v0  ;;  %v1959_v0 = vld [vmem:[%s2997_s4 + $0x60] ss:$8 sps:$4 sm:$0xff]  }
 0x608   :  { %1233 = vmatmul.mubr.bf16.vlgmr.msra.gmra.mrb[40].mxu0 %v1199_v51  ;;  %1274 = vmatmul.mubr.bf16.vlgmr.msra.gmra.mrb[40].mxu1 %v1199_v51  ;;  %v1964_v51 = vld [vmem:[%s2997_s4 + $0x74] ss:$8 sps:$4 sm:$0xff]  }
 0x609   :  { %1320 = vmatpush1.bf16.msra.mxu0 %v2716_v42  ;;  %1361 = vmatpush1.bf16.msra.mxu1 %v2722_v17  ;;  %v2093_v42 = vld [vmem:[%s2995_s2 + $0xe0] ss:$16 sps:$4 sm:$0xff]   ;;  %v2094_v17 = vld [vmem:[%s2995_s2 + $0xe8] ss:$16 sps:$4 sm:$0xff]  }
 0x60a   :  { %1321 = vmatprep.subr.bf16.mxu0 %v2728_v55  ;;  %1362 = vmatprep.subr.bf16.mxu1 %v2734_v5 }
 0x60b   :  { %1351 = vmatprep.mubr.bf16.mxu0 %v3032_v56  ;;  %1392 = vmatprep.mubr.bf16.mxu1 %v3032_v56 }
 0x60d   :  { %1322 = vmatpush1.bf16.msra.mxu0 %v2742_v1  ;;  %1363 = vmatpush1.bf16.msra.mxu1 %v2748_v52  ;;  %v3046_v1 = vld [vmem:[#allocation19_spill] sm:$0xff] }
 0x60e   :  { %1323 = vmatprep.subr.bf16.mxu0 %v2754_v3  ;;  %1364 = vmatprep.subr.bf16.mxu1 %v2760_v31  ;;  %v3047_v3 = vld [vmem:[#allocation20_spill] sm:$0xff] }
 0x611   :  { %1324 = vmatpush1.bf16.msra.mxu0 %v2766_v19  ;;  %1365 = vmatpush1.bf16.msra.mxu1 %v2772_v50 }
 0x612   :  { %1325 = vmatprep.subr.bf16.mxu0 %v2778_v39  ;;  %1366 = vmatprep.subr.bf16.mxu1 %v2784_v58  ;;  %v3048_v39 = vld [vmem:[#allocation21_spill] sm:$0xff] }
 0x615   :  { %1326 = vmatpush1.bf16.msra.mxu0 %v2790_v12  ;;  %1367 = vmatpush1.bf16.msra.mxu1 %v2796_v13  ;;  %v3049_v12 = vld [vmem:[#allocation22_spill] sm:$0xff] }
 0x616   :  { %1327 = vmatprep.subr.bf16.mxu0 %v2802_v14  ;;  %1368 = vmatprep.subr.bf16.mxu1 %v2808_v15 }
 0x619   :  { %1328 = vmatpush1.bf16.msra.mxu0 %v2081_v7  ;;  %1369 = vmatpush1.bf16.msra.mxu1 %v2082_v4  ;;  %v1962_v7 = vld [vmem:[%s2997_s4 + $0x70] ss:$8 sps:$4 sm:$0xff]  }
 0x61a   :  { %1329 = vmatprep.subr.bf16.mxu0 %v2083_v49  ;;  %1370 = vmatprep.subr.bf16.mxu1 %v2084_v6  ;;  %v3050_v6 = vld [vmem:[#allocation23_spill] sm:$0xff] }
 0x61d   :  { %1330 = vmatpush1.bf16.msra.mxu0 %v2085_v2  ;;  %1371 = vmatpush1.bf16.msra.mxu1 %v2086_v27  ;;  %v3051_v27 = vld [vmem:[#allocation24_spill] sm:$0xff] }
 0x61e   :  { %1331 = vmatprep.subr.bf16.mxu0 %v2087_v8  ;;  %1372 = vmatprep.subr.bf16.mxu1 %v2088_v9 }
 0x621   :  { %1332 = vmatpush1.bf16.msra.mxu0 %v2089_v26  ;;  %1373 = vmatpush1.bf16.msra.mxu1 %v2090_v38  ;;  %v3052_v38 = vld [vmem:[#allocation25_spill] sm:$0xff] }
 0x622   :  { %1333 = vmatprep.subr.bf16.mxu0 %v2091_v16  ;;  %1374 = vmatprep.subr.bf16.mxu1 %v2092_v54  ;;  %v3053_v54 = vld [vmem:[#allocation26_spill] sm:$0xff] }
 0x625   :  { %1334 = vmatpush1.bf16.msra.mxu0 %v2093_v42  ;;  %1375 = vmatpush1.bf16.msra.mxu1 %v2094_v17 }
 0x626   :  { %1551 = vmatprep.subr.bf16.mxu0 %v1943_v24 }
 0x6db   :  { %v1234_v55 = vpop.f32.mrb[40].mxu0  ;;  %v1275_v5 = vpop.f32.mrb[40].mxu1 }
 0x6dc   :  { %v1289_v52 = vadd.f32 %v1234_v55, %v3046_v1  ;;  %v1291_v31 = vadd.f32 %v1275_v5, %v3047_v3  ;;  %v1236_v19 = vpop.f32.mrb[41].mxu0  ;;  %v1277_v50 = vpop.f32.mrb[41].mxu1 }
 0x6dd   :  { %v1290_v58 = vadd.f32 %v1236_v19, %v3048_v39  ;;  %v1292_v13 = vadd.f32 %v1277_v50, %v3049_v12  ;;  %v1238_v14 = vpop.f32.mrb[42].mxu0  ;;  %v1279_v15 = vpop.f32.mrb[42].mxu1 }
 0x6de   :  { %v1293_v32 = vmul.f32 0.5, %v1289_v52  ;;  %v1239_v33 = vpop.f32.mrb[43].mxu0  ;;  %v1280_v34 = vpop.f32.mrb[43].mxu1 }
 0x6df   :  { %v1297_v35 = vmul.f32 0.5, %v1290_v58  ;;  %v1302_v36 = vmul.f32 0.5, %v1292_v13 }
 0x6e0   :  { %2031 = vtanh.f32 %v1293_v32 }
 0x6e1   :  { %2033 = vtanh.f32 %v1297_v35 }
 0x6e2   :  { %2035 = vtanh.f32 %v1291_v31 }
 0x6e3   :  { %2037 = vtanh.f32 %v1302_v36 }
 0x6ea   :  { %v2032_v37 = vpop.eup %2031 }
 0x6eb   :  { %v2034_v40 = vpop.eup %2033  ;;  %v1295_v41 = vmul.f32 0.5, %v2032_v37 }
 0x6ec   :  { %v1299_v43 = vmul.f32 0.5, %v2034_v40  ;;  %v2036_v45 = vpop.eup %2035 }
 0x6ed   :  { %v1296_v44 = vadd.f32 0.5, %v1295_v41  ;;  %v2038_v48 = vpop.eup %2037 }
 0x6ee   :  { %v1300_v46 = vadd.f32 0.5, %v1299_v43  ;;  %v1304_v21 = vmul.f32 0.5, %v2038_v48  ;;  %v1459_v43 = vld [vmem:[%s2998_s5] sm:$0x3] }
 0x6ef   :  { %v1307_v18 = vmul.f32 %v2036_v45, %v1296_v44  ;;  %v3054_v44 = vld [vmem:[#allocation5_spill] sm:$0xff] }
 0x6f0   :  { %v1306_v47 = vmul.f32 %v1300_v46, %v2832_v59  ;;  %v1305_v10 = vadd.f32 0.5, %v1304_v21  ;;  %v1955_v59 = vld [vmem:[%s2997_s4 + $0x44] ss:$8 sps:$4 sm:$0xff]   ;;  %v3055_v45 = vsub.s32 0, %v3054_v44 }
 0x6f2   :  { %v2900_v20 = vadd.f32 %v1307_v18, %v1306_v47  ;;  %v1464_v46 = vrot.slane %v1459_v43, %v3055_v45 }
 0x6f4   :  { %2039 = vtanh.f32 %v2900_v20 }
 0x6fe   :  { %v2040_v11 = vpop.eup %2039 }
 0x6ff   :  { %v1310_v22 = vmul.f32 %v2040_v11, %v1305_v10  ;;  %v2097_v10 = vmov 0.0   ;;  %v1965_v11 = vld [vmem:[%s2999_s6] sm:$0xff]  }
 0x700   :  { %1862 = vmatprep.subr.bf16.mxu1 %v2097_v10 }
 0x701   :  { %v1318_v23 = vpack.c.bf16 %v1310_v22, %v1310_v22  ;;  %v1966_v22 = vld [vmem:[%s2999_s6 + $0x8] sm:$0xff]  }
 0x703   :  { %1352 = vmatmul.mubr.bf16.vlgmr.msra.gmra.mrb[44].mxu0 %v1318_v23  ;;  %1393 = vmatmul.mubr.bf16.vlgmr.msra.gmra.mrb[44].mxu1 %v1318_v23  ;;  %v1967_v23 = vld [vmem:[%s2999_s6 + $0x10] sm:$0xff]  }
 0x704   :  { %1583 = vmatprep.mubr.bf16.mxu0 %v3032_v56  ;;  %1552 = vmatpush1.bf16.msra.mxu0 %v1941_v25  ;;  %v1949_v56 = vld [vmem:[%s2997_s4 + $0x24] ss:$8 sps:$4 sm:$0xff]   ;;  %v1968_v25 = vld [vmem:[%s2999_s6 + $0x18] sm:$0xff]  }
 0x705   :  { %1553 = vmatprep.subr.bf16.mxu0 %v1946_v28  ;;  %1863 = vmatpush3.bf16.msra.mxu1 %v1965_v11 }
 0x706   :  { %1864 = vmatprep.subr.bf16.mxu1 %v2097_v10  ;;  %1870 = vmatprep.mubr.msk.bf16.mxu1 %vm2099_vm1, %v2097_v10 }
 0x708   :  { %1554 = vmatpush1.bf16.msra.mxu0 %v1944_v29  ;;  %v3056_v29 = vsub.s32 1, %v3054_v44 }
 0x709   :  { %1555 = vmatprep.subr.bf16.mxu0 %v1949_v56  ;;  %1865 = vmatpush3.bf16.msra.mxu1 %v1966_v22 }
 0x70a   :  { %1866 = vmatprep.subr.bf16.mxu1 %v2097_v10  ;;  %v1468_v56 = vrot.slane %v1459_v43, %v3056_v29 }
 0x70c   :  { %1556 = vmatpush1.bf16.msra.mxu0 %v1947_v30 }
 0x70d   :  { %1557 = vmatprep.subr.bf16.mxu0 %v1952_v53  ;;  %1867 = vmatpush3.bf16.msra.mxu1 %v1967_v23 }
 0x70e   :  { %1868 = vmatprep.subr.bf16.mxu1 %v2097_v10 }
 0x710   :  { %1558 = vmatpush1.bf16.msra.mxu0 %v1950_v57 }
 0x711   :  { %1559 = vmatprep.subr.bf16.mxu0 %v1955_v59  ;;  %1869 = vmatpush3.bf16.msra.mxu1 %v1968_v25 }
 0x712   :  { %1874 = vmatprep.subr.bf16.mxu1 %v2097_v10 }
 0x714   :  { %1560 = vmatpush1.bf16.msra.mxu0 %v1953_v61 }
 0x715   :  { %1561 = vmatprep.subr.bf16.mxu0 %v1958_v60 }
 0x718   :  { %1562 = vmatpush1.bf16.msra.mxu0 %v1956_v62 }
 0x719   :  { %1563 = vmatprep.subr.bf16.mxu0 %v1961_v63 }
 0x71c   :  { %1564 = vmatpush1.bf16.msra.mxu0 %v1959_v0 }
 0x71d   :  { %1565 = vmatprep.subr.bf16.mxu0 %v1964_v51 }
 0x720   :  { %1566 = vmatpush1.bf16.msra.mxu0 %v1962_v7 }
 0x7d6   :  { %v1353_v4 = vpop.f32.mrb[44].mxu0  ;;  %v1394_v49 = vpop.f32.mrb[44].mxu1 }
 0x7d7   :  { %v1408_v2 = vadd.f32 %v1353_v4, %v3050_v6  ;;  %v1410_v8 = vadd.f32 %v1394_v49, %v3051_v27  ;;  %v1355_v9 = vpop.f32.mrb[45].mxu0  ;;  %v1396_v26 = vpop.f32.mrb[45].mxu1  ;;  %v1969_v6 = vld [vmem:[%s3000_s8] sm:$0xff]  }
 0x7d8   :  { %v1409_v16 = vadd.f32 %v1355_v9, %v3052_v38  ;;  %v1411_v42 = vadd.f32 %v1396_v26, %v3053_v54  ;;  %v1357_v17 = vpop.f32.mrb[46].mxu0  ;;  %v1398_v55 = vpop.f32.mrb[46].mxu1  ;;  %v1844_v27 = vld [vmem:[%s3001_s7] ss:$0 sm:$0xff] }
 0x7d9   :  { %v1412_v5 = vmul.f32 0.5, %v1408_v2  ;;  %v1358_v1 = vpop.f32.mrb[47].mxu0  ;;  %v1399_v52 = vpop.f32.mrb[47].mxu1  ;;  %v1970_v2 = vld [vmem:[%s3000_s8 + $0x8] sm:$0xff]   ;;  %v1850_v17 = vld [vmem:[%s3002_s9] ss:$0 sm:$0xff] }
 0x7da   :  { %v1416_v3 = vmul.f32 0.5, %v1409_v16  ;;  %v1421_v31 = vmul.f32 0.5, %v1411_v42 }
 0x7db   :  { %2041 = vtanh.f32 %v1412_v5 }
 0x7dc   :  { %2043 = vtanh.f32 %v1416_v3 }
 0x7dd   :  { %2045 = vtanh.f32 %v1410_v8 }
 0x7de   :  { %2047 = vtanh.f32 %v1421_v31 }
 0x7e5   :  { %v2042_v19 = vpop.eup %2041 }
 0x7e6   :  { %v2044_v50 = vpop.eup %2043  ;;  %v1414_v39 = vmul.f32 0.5, %v2042_v19 }
 0x7e7   :  { %v1418_v58 = vmul.f32 0.5, %v2044_v50  ;;  %v2046_v13 = vpop.eup %2045 }
 0x7e8   :  { %v1415_v12 = vadd.f32 0.5, %v1414_v39  ;;  %v2048_v34 = vpop.eup %2047 }
 0x7e9   :  { %v1419_v14 = vadd.f32 0.5, %v1418_v58  ;;  %v1423_v35 = vmul.f32 0.5, %v2048_v34 }
 0x7ea   :  { %v1426_v15 = vmul.f32 %v2046_v13, %v1415_v12 }
 0x7eb   :  { %v1425_v32 = vmul.f32 %v1419_v14, %v2900_v20  ;;  %v1424_v36 = vadd.f32 0.5, %v1423_v35 }
 0x7ed   :  { %v1427_v33 = vadd.f32 %v1426_v15, %v1425_v32 }
 0x7ef   :  { %2049 = vtanh.f32 %v1427_v33 }
 0x7f9   :  { %v2050_v37 = vpop.eup %2049 }
 0x7fa   :  { %v1429_v40 = vmul.f32 %v2050_v37, %v1424_v36 }
 0x7fc   :  { %v1442_v41 = vpack.c.bf16 %v1429_v40, %v1429_v40 }
 0x7fe   :  { %1584 = vmatmul.mubr.bf16.vlgmr.msra.gmra.mrb[48].mxu0 %v1442_v41 }
 0x8d1   :  { %v1585_v18 = vpop.f32.mrb[48].mxu0 }
 0x8d2   :  { %v1586_v47 = vadd.f32 %v1585_v18, %v1464_v46  ;;  %v1587_v48 = vpop.f32.mrb[49].mxu0 }
 0x8d3   :  { %v1589_v20 = vpop.f32.mrb[50].mxu0  ;;  %v1588_v30 = vadd.f32 %v1587_v48, %v1468_v56 }
 0x8d4   :  { %2051 = vtanh.f32 %v1586_v47  ;;  %v1590_v21 = vpop.f32.mrb[51].mxu0  ;;  %v1592_v28 = vmul.f32 0.5, %v1586_v47 }
 0x8d5   :  { %v1597_v53 = vmul.f32 0.5, %v1588_v30 }
 0x8d6   :  { %2053 = vtanh.f32 %v1592_v28 }
 0x8d7   :  { %2055 = vtanh.f32 %v1597_v53 }
 0x8de   :  { %v2052_v24 = vpop.eup %2051 }
 0x8df   :  { %1602 = vrot.lane.b32.xlu0 %v2052_v24, %s2098_s25 }
 0x8e0   :  { %v2054_v57 = vpop.eup %2053 }
 0x8e1   :  { %v1594_v59 = vmul.f32 0.5, %v2054_v57  ;;  %v2056_v63 = vpop.eup %2055 }
 0x8e2   :  { %v1599_v0 = vmul.f32 0.5, %v2056_v63 }
 0x8e3   :  { %v1595_v61 = vadd.f32 0.5, %v1594_v59 }
 0x8e4   :  { %v1600_v51 = vadd.f32 0.5, %v1599_v0 }
 0x951   :  { %v1603_v60 = vpop.permute.xlu0 %1602 }
 0x952   :  { %v1605_v62 = vmul.f32 %v1603_v60, %v1595_v61 }
 0x954   :  { %2057 = vtanh.f32 %v1605_v62 }
 0x95e   :  { %v2058_v7 = vpop.eup %2057 }
 0x95f   :  { %v1607_v4 = vmul.f32 %v2058_v7, %v1600_v51 }
 0x961   :  { %v1608_v49 = vpack.c.bf16 %v1607_v4, %v1607_v4 }
 0x963   :  { %1871 = vmatmul.mubr.msk.bf16.vlgmr.msra.gmra.mrb[48].mxu1 %vm1648_vm2, %v1608_v49 }
 0x964   :  { %1878 = vmatprep.mubr.msk.bf16.mxu1 %vm2099_vm1, %v2097_v10  ;;  %1875 = vmatpush3.bf16.msra.mxu1 %v1969_v6 }
 0x965   :  { %1876 = vmatprep.subr.bf16.mxu1 %v2097_v10 }
 0x968   :  { %1877 = vmatpush3.bf16.msra.mxu1 %v1970_v2 }
 0xa36   :  { %v1686_v8 = vpop.f32.mrb[48].mxu1 }
 0xa37   :  { %v1687_v9 = vadd.f32 %v1844_v27, %v1686_v8  ;;  %v1872_v26 = vpop.f32.mrb[49].mxu1 }
 0xa38   :  { %v1689_v38 = vpop.f32.mrb[50].mxu1 }
 0xa39   :  { %v1692_v16 = vmax.f32 %v1687_v9, 0.0  ;;  %v1873_v54 = vpop.f32.mrb[51].mxu1 }
 0xa3b   :  { %v1693_v42 = vpack.c.bf16 %v1692_v16, %v1692_v16 }
 0xa3d   :  { %1879 = vmatmul.mubr.msk.bf16.vlgmr.msra.gmra.mrb[52].mxu1 %vm1717_vm3, %v1693_v42 }
 0xb10   :  { %v1755_v55 = vpop.f32.mrb[52].mxu1 }
 0xb11   :  { %v1756_v5 = vadd.f32 %v1850_v17, %v1755_v55  ;;  %v1880_v1 = vpop.f32.mrb[53].mxu1 }
 0xb12   :  { %v1758_v52 = vpop.f32.mrb[54].mxu1 }
 0xb13   :  { %1761 = vmax.xlane.f32.xlu0 %v1756_v5  ;;  %v1881_v3 = vpop.f32.mrb[55].mxu1 }
 0xba0   :  { %v1762_v31 = vpop.xlane.xlu0 %1761 }
 0xba1   :  { %v1763_v19 = vsub.f32 %v1756_v5, %v1762_v31 }
 0xba3   :  { %v1764_v50 = vmul.f32 1.442695, %v1763_v19 }
 0xba5   :  { %2059 = vpow2.f32 %v1764_v50 }
 0xbaf   :  { %v2060_v39 = vpop.eup %2059 }
 0xbb0   :  { %1766 = vadd.xlane.f32.xlu1 %v2060_v39 }
 0xc3d   :  { %v1767_v58 = vpop.xlane.xlu1 %1766 }
 0xc3e   :  { %2061 = vlog2.f32 %v1767_v58 }
 0xc48   :  { %v2062_v12 = vpop.eup %2061 }
 0xc49   :  { %v1769_v13 = vmul.f32 0.6931472, %v2062_v12 }
 0xc4b   :  { %v1770_v14 = vadd.f32 %v1769_v13, %v1762_v31 }
 0xc4d   :  { %v1771_v15 = vsub.f32 %v1756_v5, %v1770_v14 }
 0xc4f   :  { %1772 = vst [vmem:[%s3003_s10] sm:$0xff] %v1771_v15 }

</bundles_post_ra>
